<compile_context>
chip_gen: v6e
topology: v6e:2x2x1
jax: 0.10.0
libtpu: 0.0.40
codegen_flags: <defaults>
</compile_context>

<pallas_src>
import functools
import math

import jax
import jax.numpy as jnp
from jax import lax
from jax.experimental import pallas as pl
from jax.experimental.pallas import tpu as pltpu


def mha_kernel(seq1_ref, seq2_ref, wq_ref, bq_ref, wkv_ref, bkv_ref, o_ref,
               *, n_head, model_dim, n_v, seq_num):
    # Block shapes:
    #   seq1_ref: (BB, E)  bf16        seq2_ref: (BB*S, E)  bf16
    #   wq_ref  : (H*Dm, E) bf16       bq_ref  : (1, H*Dm)  f32   (scale folded in)
    #   wkv_ref : (H*Dm+E, E) bf16     bkv_ref : (1, H*Dm+E) f32
    #   o_ref   : (BB, E)  f32
    bb, encode_dim = seq1_ref.shape
    hdm = n_head * model_dim

    x1 = seq1_ref[...]                               # (BB, E)
    x2 = seq2_ref[...]                               # (BB*S, E)

    # All-head Q projection for the whole batch block in one matmul
    # (contract last axes => x @ W^T without materialising a transposed weight).
    q = lax.dot_general(x1, wq_ref[...], (((1,), (1,)), ((), ())),
                        preferred_element_type=jnp.float32) + bq_ref[...]      # (BB, H*Dm)

    # Fused K/V projection over all BB*S rows of the seq2 block.
    kv = lax.dot_general(x2, wkv_ref[...], (((1,), (1,)), ((), ())),
                         preferred_element_type=jnp.float32) + bkv_ref[...]    # (BB*S, H*Dm+E)

    # bf16 operands for the (tiny) attention matmuls; f32 accumulation throughout.
    q3 = q.astype(jnp.bfloat16).reshape(bb, 1, hdm)                 # (BB, 1, H*Dm)
    k3 = kv[:, :hdm].astype(jnp.bfloat16).reshape(bb, seq_num, hdm)  # (BB, S, H*Dm)
    v3 = kv[:, hdm:].astype(jnp.bfloat16).reshape(bb, seq_num, encode_dim)  # (BB, S, E)

    # Per-head attention, batched over the BB rows via 3-D einsums (static unroll,
    # H is small).  Each head's result is written straight into its lane slice of
    # the output block; the block is written back to HBM once per grid step.
    for h in range(n_head):
        d0, d1 = h * model_dim, (h + 1) * model_dim
        v0, v1 = h * n_v, (h + 1) * n_v

        q_h = q3[:, :, d0:d1]                        # (BB, 1, Dm)
        k_h = k3[:, :, d0:d1]                        # (BB, S, Dm)
        v_h = v3[:, :, v0:v1]                        # (BB, S, n_v)

        # scores: (BB, 1, S); the 1/sqrt(Dm) scale is already folded into Wq/bq.
        s = jnp.einsum('bqd,bkd->bqk', q_h, k_h,
                       preferred_element_type=jnp.float32)
        # Numerically-stable softmax over the key axis (torch.nn.Softmax(dim=-1)),
        # one max/exp/sum over the whole (BB,1,S) slab; divide on the EUP.
        s = s - jnp.max(s, axis=-1, keepdims=True)
        p = jnp.exp(s)
        inv_l = pl.reciprocal(jnp.sum(p, axis=-1, keepdims=True), approx=True)
        attn = (p * inv_l).astype(jnp.bfloat16)

        o_h = jnp.einsum('bqk,bkd->bqd', attn, v_h,
                         preferred_element_type=jnp.float32)          # (BB, 1, n_v)
        o_ref[:, v0:v1] = o_h.reshape(bb, n_v).astype(o_ref.dtype)


def prepare_params(params, *, n_head, model_dim):
    """One-time parameter prep (outside the hot path): fold the attention scale
    into Wq/bq, fuse Wk/Wv into one wide projection, cast weights to bf16."""
    scale = 1.0 / math.sqrt(model_dim)
    wkv = jnp.concatenate([params["wk"], params["wv"]], axis=0)       # (H*Dm+E, E)
    bkv = jnp.concatenate([params["bk"], params["bv"]], axis=0)       # (H*Dm+E,)
    return {
        "wq": (params["wq"] * scale).astype(jnp.bfloat16),            # (H*Dm, E)
        "bq": (params["bq"] * scale)[None, :].astype(jnp.float32),    # (1, H*Dm)
        "wkv": wkv.astype(jnp.bfloat16),                              # (H*Dm+E, E)
        "bkv": bkv[None, :].astype(jnp.float32),                      # (1, H*Dm+E)
    }


def _pick_batch_block(batch, seq_num, encode_dim, hdm, vmem_budget_bytes):
    """Largest multiple-of-8 divisor of `batch` whose per-step footprint fits the
    VMEM budget, preferring grid length >= 2 (v7x has 2 TensorCores)."""
    def footprint(bb):
        io = 2 * (bb * encode_dim * 2 + bb * seq_num * encode_dim * 2)   # bf16 in, 2 bufs
        out = 2 * (bb * encode_dim * 4)                                  # f32 out, 2 bufs
        w = 2 * ((2 * hdm + encode_dim) * encode_dim * 2)                # bf16 weights, 2 bufs
        scratch = 3 * bb * seq_num * (hdm + encode_dim) * 4              # kv f32 + temporaries
        return io + out + w + scratch

    for bb in (1024, 512, 256, 128, 64, 32, 16, 8):
        if bb < batch and batch % bb == 0 and footprint(bb) <= vmem_budget_bytes:
            return bb
    return batch   # single step: every block equals the full array dims.


def multi_head_attention(seq1, seq2, prepared, *, n_head, model_dim,
                         mask=None, block_batch=None):
    if mask is not None:
        raise NotImplementedError("mask is not supported (mask=None path only)")
    batch, seq_num, encode_dim = seq2.shape
    if seq1.shape != (batch, 1, encode_dim):
        raise ValueError(f"seq1 must have shape {(batch, 1, encode_dim)}, got {seq1.shape}")
    if encode_dim % n_head != 0:
        raise ValueError("encode_dim must be divisible by n_head")
    n_v = encode_dim // n_head
    hdm = n_head * model_dim

    # Per-generation VMEM budget (v7x: 64 MiB/TC, v5e/v6e: 128 MiB).
    try:
        vmem_cap = int(pltpu.get_tpu_info().vmem_capacity_bytes)
        vmem_limit = min(vmem_cap * 3 // 4, 100 << 20)
    except Exception:
        vmem_limit = None
    budget = vmem_limit if vmem_limit is not None else (32 << 20)

    bb = block_batch if block_batch is not None else _pick_batch_block(
        batch, seq_num, encode_dim, hdm, budget)
    if batch % bb != 0:
        raise ValueError(f"block_batch={bb} must divide batch={batch}")

    # Flatten to 2-D (free reshapes) so every kernel ref is a clean lane-dense slab,
    # and cast the streamed activations to bf16 (halves HBM->VMEM traffic).
    seq1_2d = seq1.reshape(batch, encode_dim).astype(jnp.bfloat16)
    seq2_2d = seq2.reshape(batch * seq_num, encode_dim).astype(jnp.bfloat16)

    kernel = functools.partial(mha_kernel, n_head=n_head, model_dim=model_dim,
                               n_v=n_v, seq_num=seq_num)

    cp_kwargs = dict(dimension_semantics=("parallel",))
    if vmem_limit is not None:
        cp_kwargs["vmem_limit_bytes"] = vmem_limit

    out2d = pl.pallas_call(
        kernel,
        out_shape=jax.ShapeDtypeStruct((batch, encode_dim), jnp.float32),
        grid_spec=pltpu.PrefetchScalarGridSpec(
            num_scalar_prefetch=0,
            grid=(batch // bb,),
            in_specs=[
                pl.BlockSpec((bb, encode_dim), lambda b: (b, 0)),              # seq1
                pl.BlockSpec((bb * seq_num, encode_dim), lambda b: (b, 0)),    # seq2 (flat)
                # Constant block index -> weights stay VMEM-resident across the grid.
                pl.BlockSpec((hdm, encode_dim), lambda b: (0, 0)),             # Wq (scaled)
                pl.BlockSpec((1, hdm), lambda b: (0, 0)),                      # bq (scaled)
                pl.BlockSpec((hdm + encode_dim, encode_dim), lambda b: (0, 0)),  # Wkv
                pl.BlockSpec((1, hdm + encode_dim), lambda b: (0, 0)),         # bkv
            ],
            out_specs=pl.BlockSpec((bb, encode_dim), lambda b: (b, 0)),
        ),
        compiler_params=pltpu.CompilerParams(**cp_kwargs),
    )(seq1_2d, seq2_2d, prepared["wq"], prepared["bq"],
      prepared["wkv"], prepared["bkv"])

    return out2d.reshape(batch, 1, encode_dim)


def mha_reference(seq1, seq2, params, *, n_head, model_dim):
    """Pure-JAX (f32) replica of the PyTorch forward (mask=None)."""
    batch, seq_num, encode_dim = seq2.shape
    n_v = encode_dim // n_head
    q = seq1 @ params["wq"].T + params["bq"]
    k = seq2 @ params["wk"].T + params["bk"]
    v = seq2 @ params["wv"].T + params["bv"]
    q = q.reshape(batch, 1, n_head, model_dim).transpose(0, 2, 1, 3)
    k = k.reshape(batch, seq_num, n_head, model_dim).transpose(0, 2, 1, 3)
    v = v.reshape(batch, seq_num, n_head, n_v).transpose(0, 2, 1, 3)
    score = (q @ jnp.swapaxes(k, 2, 3)) / math.sqrt(model_dim)
    score = jax.nn.softmax(score, axis=-1) @ v
    return score.transpose(0, 2, 1, 3).reshape(batch, 1, encode_dim)


if __name__ == "__main__":
    batch, seq_num = 16, 8
    encode_dim, model_dim, n_head = 32, 16, 4

    key = jax.random.PRNGKey(0)
    ks = jax.random.split(key, 8)
    params = {
        "wq": 0.05 * jax.random.normal(ks[0], (n_head * model_dim, encode_dim), jnp.float32),
        "bq": 0.05 * jax.random.normal(ks[1], (n_head * model_dim,), jnp.float32),
        "wk": 0.05 * jax.random.normal(ks[2], (n_head * model_dim, encode_dim), jnp.float32),
        "bk": 0.05 * jax.random.normal(ks[3], (n_head * model_dim,), jnp.float32),
        "wv": 0.05 * jax.random.normal(ks[4], (encode_dim, encode_dim), jnp.float32),
        "bv": 0.05 * jax.random.normal(ks[5], (encode_dim,), jnp.float32),
    }
    seq1 = jax.random.normal(ks[6], (batch, 1, encode_dim), jnp.float32)
    seq2 = jax.random.normal(ks[7], (batch, seq_num, encode_dim), jnp.float32)

    prepared = prepare_params(params, n_head=n_head, model_dim=model_dim)  # once, off hot path
    out = multi_head_attention(seq1, seq2, prepared, n_head=n_head, model_dim=model_dim)
    out = jax.block_until_ready(out)

    ref = mha_reference(seq1, seq2, params, n_head=n_head, model_dim=model_dim)
    assert out.shape == (batch, 1, encode_dim), out.shape
    # bf16 MXU inputs (f32 accumulation) -> relaxed tolerance vs. the f32 reference.
    assert jnp.allclose(out, ref, atol=2e-2, rtol=2e-2), "mismatch vs JAX reference"
    print("KERNEL_OK")
</pallas_src>

<mosaic_0001>
module attributes {stable_mosaic.version = 11 : i64} {
  func.func @mha_kernel(%arg0: i32, %arg1: memref<8x32xbf16, #tpu.memory_space<vmem>>, %arg2: memref<64x32xbf16, #tpu.memory_space<vmem>>, %arg3: memref<64x32xbf16, #tpu.memory_space<vmem>>, %arg4: memref<1x64xf32, #tpu.memory_space<vmem>>, %arg5: memref<96x32xbf16, #tpu.memory_space<vmem>>, %arg6: memref<1x96xf32, #tpu.memory_space<vmem>>, %arg7: memref<8x32xf32, #tpu.memory_space<vmem>>) attributes {dimension_semantics = [#tpu.dimension_semantics<parallel>], iteration_bounds = array<i64: 2>, scalar_prefetch = 0 : i64, scratch_operands = 0 : i64, tpu.core_type = #tpu.core_type<tc>, window_params = [{transform_indices = @transform_0, window_bounds = array<i64: 8, 32>}, {transform_indices = @transform_1, window_bounds = array<i64: 64, 32>}, {pipeline_mode = #tpu.pipeline_mode<synchronous>, transform_indices = @transform_2, window_bounds = array<i64: 64, 32>}, {pipeline_mode = #tpu.pipeline_mode<synchronous>, transform_indices = @transform_3, window_bounds = array<i64: 1, 64>}, {pipeline_mode = #tpu.pipeline_mode<synchronous>, transform_indices = @transform_4, window_bounds = array<i64: 96, 32>}, {pipeline_mode = #tpu.pipeline_mode<synchronous>, transform_indices = @transform_5, window_bounds = array<i64: 1, 96>}, {transform_indices = @transform_6, window_bounds = array<i64: 8, 32>}]} {
    %c0 = arith.constant 0 : index
    %c0_0 = arith.constant 0 : index
    %0 = vector.load %arg1[%c0, %c0_0] : memref<8x32xbf16, #tpu.memory_space<vmem>>, vector<8x32xbf16>
    %c0_1 = arith.constant 0 : index
    %c0_2 = arith.constant 0 : index
    %1 = vector.load %arg2[%c0_1, %c0_2] : memref<64x32xbf16, #tpu.memory_space<vmem>>, vector<64x32xbf16>
    %c0_3 = arith.constant 0 : index
    %c0_4 = arith.constant 0 : index
    %2 = vector.load %arg3[%c0_3, %c0_4] : memref<64x32xbf16, #tpu.memory_space<vmem>>, vector<64x32xbf16>
    %cst = arith.constant dense<0.000000e+00> : vector<8x64xf32>
    %3 = tpu.matmul %0, %2, %cst {dimension_numbers = #tpu.dot_dimension_numbers<[1], [1], [0], [0], [0, 0, 1, 0], [], []>} : vector<8x32xbf16>, vector<64x32xbf16>, vector<8x64xf32> -> vector<8x64xf32>
    %c0_5 = arith.constant 0 : index
    %c0_6 = arith.constant 0 : index
    %4 = vector.load %arg4[%c0_5, %c0_6] : memref<1x64xf32, #tpu.memory_space<vmem>>, vector<1x64xf32>
    %5 = vector.broadcast %4 : vector<1x64xf32> to vector<8x64xf32>
    %6 = arith.addf %3, %5 : vector<8x64xf32>
    %c0_7 = arith.constant 0 : index
    %c0_8 = arith.constant 0 : index
    %7 = vector.load %arg5[%c0_7, %c0_8] : memref<96x32xbf16, #tpu.memory_space<vmem>>, vector<96x32xbf16>
    %cst_9 = arith.constant dense<0.000000e+00> : vector<64x96xf32>
    %8 = tpu.matmul %1, %7, %cst_9 {dimension_numbers = #tpu.dot_dimension_numbers<[1], [1], [0], [0], [0, 0, 1, 0], [], []>} : vector<64x32xbf16>, vector<96x32xbf16>, vector<64x96xf32> -> vector<64x96xf32>
    %c0_10 = arith.constant 0 : index
    %c0_11 = arith.constant 0 : index
    %9 = vector.load %arg6[%c0_10, %c0_11] : memref<1x96xf32, #tpu.memory_space<vmem>>, vector<1x96xf32>
    %10 = vector.broadcast %9 : vector<1x96xf32> to vector<64x96xf32>
    %11 = arith.addf %8, %10 : vector<64x96xf32>
    %12 = arith.truncf %6 : vector<8x64xf32> to vector<8x64xbf16>
    %13 = vector.shape_cast %12 : vector<8x64xbf16> to vector<8x1x64xbf16>
    %14 = vector.extract_strided_slice %11 {offsets = [0, 0], sizes = [64, 64], strides = [1, 1]} : vector<64x96xf32> to vector<64x64xf32>
    %15 = arith.truncf %14 : vector<64x64xf32> to vector<64x64xbf16>
    %16 = vector.shape_cast %15 : vector<64x64xbf16> to vector<8x8x64xbf16>
    %17 = vector.extract_strided_slice %11 {offsets = [0, 64], sizes = [64, 32], strides = [1, 1]} : vector<64x96xf32> to vector<64x32xf32>
    %18 = arith.truncf %17 : vector<64x32xf32> to vector<64x32xbf16>
    %19 = vector.shape_cast %18 : vector<64x32xbf16> to vector<8x8x32xbf16>
    %20 = vector.extract_strided_slice %13 {offsets = [0, 0, 0], sizes = [8, 1, 16], strides = [1, 1, 1]} : vector<8x1x64xbf16> to vector<8x1x16xbf16>
    %21 = vector.extract_strided_slice %16 {offsets = [0, 0, 0], sizes = [8, 8, 16], strides = [1, 1, 1]} : vector<8x8x64xbf16> to vector<8x8x16xbf16>
    %22 = vector.extract_strided_slice %19 {offsets = [0, 0, 0], sizes = [8, 8, 8], strides = [1, 1, 1]} : vector<8x8x32xbf16> to vector<8x8x8xbf16>
    "tpu.trace_start"() <{level = 10 : i32, message = "bqd,bkd->bqk"}> : () -> ()
    %cst_12 = arith.constant dense<0.000000e+00> : vector<8x1x8xf32>
    %23 = tpu.matmul %20, %21, %cst_12 {dimension_numbers = #tpu.dot_dimension_numbers<[2], [2], [1], [1], [0, 0, 0, 1, 1, 1], [0], [0]>} : vector<8x1x16xbf16>, vector<8x8x16xbf16>, vector<8x1x8xf32> -> vector<8x1x8xf32>
    "tpu.trace_stop"() : () -> ()
    %cst_13 = arith.constant dense<0xFF800000> : vector<8x1xf32>
    %24 = vector.multi_reduction <maximumf>, %23, %cst_13 [2] : vector<8x1x8xf32> to vector<8x1xf32>
    %25 = vector.shape_cast %24 : vector<8x1xf32> to vector<8x1x1xf32>
    %26 = vector.broadcast %25 : vector<8x1x1xf32> to vector<8x1x8xf32>
    %27 = arith.subf %23, %26 : vector<8x1x8xf32>
    %28 = math.exp %27 : vector<8x1x8xf32>
    %cst_14 = arith.constant dense<0.000000e+00> : vector<8x1xf32>
    %29 = vector.multi_reduction <add>, %28, %cst_14 [2] : vector<8x1x8xf32> to vector<8x1xf32>
    %30 = vector.shape_cast %29 : vector<8x1xf32> to vector<8x1x1xf32>
    %31 = tpu.reciprocal %30 {approx = true} : vector<8x1x1xf32> -> vector<8x1x1xf32>
    %32 = vector.broadcast %31 : vector<8x1x1xf32> to vector<8x1x8xf32>
    %33 = arith.mulf %28, %32 : vector<8x1x8xf32>
    %34 = arith.truncf %33 : vector<8x1x8xf32> to vector<8x1x8xbf16>
    "tpu.trace_start"() <{level = 10 : i32, message = "bqk,bkd->bqd"}> : () -> ()
    %cst_15 = arith.constant dense<0.000000e+00> : vector<8x1x8xf32>
    %35 = tpu.matmul %34, %22, %cst_15 {dimension_numbers = #tpu.dot_dimension_numbers<[2], [1], [1], [2], [0, 0, 0, 1, 1, 2], [0], [0]>} : vector<8x1x8xbf16>, vector<8x8x8xbf16>, vector<8x1x8xf32> -> vector<8x1x8xf32>
    "tpu.trace_stop"() : () -> ()
    %36 = vector.shape_cast %35 : vector<8x1x8xf32> to vector<8x8xf32>
    %c0_16 = arith.constant 0 : index
    %c0_17 = arith.constant 0 : index
    %37 = vector.load %arg7[%c0_16, %c0_17] : memref<8x32xf32, #tpu.memory_space<vmem>>, vector<8x8xf32>
    tpu.vector_store %arg7[%c0_16, %c0_17], %36 {strides = array<i32>} : memref<8x32xf32, #tpu.memory_space<vmem>>, vector<8x8xf32>,
    %38 = vector.extract_strided_slice %13 {offsets = [0, 0, 16], sizes = [8, 1, 16], strides = [1, 1, 1]} : vector<8x1x64xbf16> to vector<8x1x16xbf16>
    %39 = vector.extract_strided_slice %16 {offsets = [0, 0, 16], sizes = [8, 8, 16], strides = [1, 1, 1]} : vector<8x8x64xbf16> to vector<8x8x16xbf16>
    %40 = vector.extract_strided_slice %19 {offsets = [0, 0, 8], sizes = [8, 8, 8], strides = [1, 1, 1]} : vector<8x8x32xbf16> to vector<8x8x8xbf16>
    "tpu.trace_start"() <{level = 10 : i32, message = "bqd,bkd->bqk"}> : () -> ()
    %cst_18 = arith.constant dense<0.000000e+00> : vector<8x1x8xf32>
    %41 = tpu.matmul %38, %39, %cst_18 {dimension_numbers = #tpu.dot_dimension_numbers<[2], [2], [1], [1], [0, 0, 0, 1, 1, 1], [0], [0]>} : vector<8x1x16xbf16>, vector<8x8x16xbf16>, vector<8x1x8xf32> -> vector<8x1x8xf32>
    "tpu.trace_stop"() : () -> ()
    %cst_19 = arith.constant dense<0xFF800000> : vector<8x1xf32>
    %42 = vector.multi_reduction <maximumf>, %41, %cst_19 [2] : vector<8x1x8xf32> to vector<8x1xf32>
    %43 = vector.shape_cast %42 : vector<8x1xf32> to vector<8x1x1xf32>
    %44 = vector.broadcast %43 : vector<8x1x1xf32> to vector<8x1x8xf32>
    %45 = arith.subf %41, %44 : vector<8x1x8xf32>
    %46 = math.exp %45 : vector<8x1x8xf32>
    %cst_20 = arith.constant dense<0.000000e+00> : vector<8x1xf32>
    %47 = vector.multi_reduction <add>, %46, %cst_20 [2] : vector<8x1x8xf32> to vector<8x1xf32>
    %48 = vector.shape_cast %47 : vector<8x1xf32> to vector<8x1x1xf32>
    %49 = tpu.reciprocal %48 {approx = true} : vector<8x1x1xf32> -> vector<8x1x1xf32>
    %50 = vector.broadcast %49 : vector<8x1x1xf32> to vector<8x1x8xf32>
    %51 = arith.mulf %46, %50 : vector<8x1x8xf32>
    %52 = arith.truncf %51 : vector<8x1x8xf32> to vector<8x1x8xbf16>
    "tpu.trace_start"() <{level = 10 : i32, message = "bqk,bkd->bqd"}> : () -> ()
    %cst_21 = arith.constant dense<0.000000e+00> : vector<8x1x8xf32>
    %53 = tpu.matmul %52, %40, %cst_21 {dimension_numbers = #tpu.dot_dimension_numbers<[2], [1], [1], [2], [0, 0, 0, 1, 1, 2], [0], [0]>} : vector<8x1x8xbf16>, vector<8x8x8xbf16>, vector<8x1x8xf32> -> vector<8x1x8xf32>
    "tpu.trace_stop"() : () -> ()
    %54 = vector.shape_cast %53 : vector<8x1x8xf32> to vector<8x8xf32>
    %c0_22 = arith.constant 0 : index
    %c8 = arith.constant 8 : index
    %55 = vector.load %arg7[%c0_22, %c8] : memref<8x32xf32, #tpu.memory_space<vmem>>, vector<8x8xf32>
    tpu.vector_store %arg7[%c0_22, %c8], %54 {strides = array<i32>} : memref<8x32xf32, #tpu.memory_space<vmem>>, vector<8x8xf32>,
    %56 = vector.extract_strided_slice %13 {offsets = [0, 0, 32], sizes = [8, 1, 16], strides = [1, 1, 1]} : vector<8x1x64xbf16> to vector<8x1x16xbf16>
    %57 = vector.extract_strided_slice %16 {offsets = [0, 0, 32], sizes = [8, 8, 16], strides = [1, 1, 1]} : vector<8x8x64xbf16> to vector<8x8x16xbf16>
    %58 = vector.extract_strided_slice %19 {offsets = [0, 0, 16], sizes = [8, 8, 8], strides = [1, 1, 1]} : vector<8x8x32xbf16> to vector<8x8x8xbf16>
    "tpu.trace_start"() <{level = 10 : i32, message = "bqd,bkd->bqk"}> : () -> ()
    %cst_23 = arith.constant dense<0.000000e+00> : vector<8x1x8xf32>
    %59 = tpu.matmul %56, %57, %cst_23 {dimension_numbers = #tpu.dot_dimension_numbers<[2], [2], [1], [1], [0, 0, 0, 1, 1, 1], [0], [0]>} : vector<8x1x16xbf16>, vector<8x8x16xbf16>, vector<8x1x8xf32> -> vector<8x1x8xf32>
    "tpu.trace_stop"() : () -> ()
    %cst_24 = arith.constant dense<0xFF800000> : vector<8x1xf32>
    %60 = vector.multi_reduction <maximumf>, %59, %cst_24 [2] : vector<8x1x8xf32> to vector<8x1xf32>
    %61 = vector.shape_cast %60 : vector<8x1xf32> to vector<8x1x1xf32>
    %62 = vector.broadcast %61 : vector<8x1x1xf32> to vector<8x1x8xf32>
    %63 = arith.subf %59, %62 : vector<8x1x8xf32>
    %64 = math.exp %63 : vector<8x1x8xf32>
    %cst_25 = arith.constant dense<0.000000e+00> : vector<8x1xf32>
    %65 = vector.multi_reduction <add>, %64, %cst_25 [2] : vector<8x1x8xf32> to vector<8x1xf32>
    %66 = vector.shape_cast %65 : vector<8x1xf32> to vector<8x1x1xf32>
    %67 = tpu.reciprocal %66 {approx = true} : vector<8x1x1xf32> -> vector<8x1x1xf32>
    %68 = vector.broadcast %67 : vector<8x1x1xf32> to vector<8x1x8xf32>
    %69 = arith.mulf %64, %68 : vector<8x1x8xf32>
    %70 = arith.truncf %69 : vector<8x1x8xf32> to vector<8x1x8xbf16>
    "tpu.trace_start"() <{level = 10 : i32, message = "bqk,bkd->bqd"}> : () -> ()
    %cst_26 = arith.constant dense<0.000000e+00> : vector<8x1x8xf32>
    %71 = tpu.matmul %70, %58, %cst_26 {dimension_numbers = #tpu.dot_dimension_numbers<[2], [1], [1], [2], [0, 0, 0, 1, 1, 2], [0], [0]>} : vector<8x1x8xbf16>, vector<8x8x8xbf16>, vector<8x1x8xf32> -> vector<8x1x8xf32>
    "tpu.trace_stop"() : () -> ()
    %72 = vector.shape_cast %71 : vector<8x1x8xf32> to vector<8x8xf32>
    %c0_27 = arith.constant 0 : index
    %c16 = arith.constant 16 : index
    %73 = vector.load %arg7[%c0_27, %c16] : memref<8x32xf32, #tpu.memory_space<vmem>>, vector<8x8xf32>
    tpu.vector_store %arg7[%c0_27, %c16], %72 {strides = array<i32>} : memref<8x32xf32, #tpu.memory_space<vmem>>, vector<8x8xf32>,
    %74 = vector.extract_strided_slice %13 {offsets = [0, 0, 48], sizes = [8, 1, 16], strides = [1, 1, 1]} : vector<8x1x64xbf16> to vector<8x1x16xbf16>
    %75 = vector.extract_strided_slice %16 {offsets = [0, 0, 48], sizes = [8, 8, 16], strides = [1, 1, 1]} : vector<8x8x64xbf16> to vector<8x8x16xbf16>
    %76 = vector.extract_strided_slice %19 {offsets = [0, 0, 24], sizes = [8, 8, 8], strides = [1, 1, 1]} : vector<8x8x32xbf16> to vector<8x8x8xbf16>
    "tpu.trace_start"() <{level = 10 : i32, message = "bqd,bkd->bqk"}> : () -> ()
    %cst_28 = arith.constant dense<0.000000e+00> : vector<8x1x8xf32>
    %77 = tpu.matmul %74, %75, %cst_28 {dimension_numbers = #tpu.dot_dimension_numbers<[2], [2], [1], [1], [0, 0, 0, 1, 1, 1], [0], [0]>} : vector<8x1x16xbf16>, vector<8x8x16xbf16>, vector<8x1x8xf32> -> vector<8x1x8xf32>
    "tpu.trace_stop"() : () -> ()
    %cst_29 = arith.constant dense<0xFF800000> : vector<8x1xf32>
    %78 = vector.multi_reduction <maximumf>, %77, %cst_29 [2] : vector<8x1x8xf32> to vector<8x1xf32>
    %79 = vector.shape_cast %78 : vector<8x1xf32> to vector<8x1x1xf32>
    %80 = vector.broadcast %79 : vector<8x1x1xf32> to vector<8x1x8xf32>
    %81 = arith.subf %77, %80 : vector<8x1x8xf32>
    %82 = math.exp %81 : vector<8x1x8xf32>
    %cst_30 = arith.constant dense<0.000000e+00> : vector<8x1xf32>
    %83 = vector.multi_reduction <add>, %82, %cst_30 [2] : vector<8x1x8xf32> to vector<8x1xf32>
    %84 = vector.shape_cast %83 : vector<8x1xf32> to vector<8x1x1xf32>
    %85 = tpu.reciprocal %84 {approx = true} : vector<8x1x1xf32> -> vector<8x1x1xf32>
    %86 = vector.broadcast %85 : vector<8x1x1xf32> to vector<8x1x8xf32>
    %87 = arith.mulf %82, %86 : vector<8x1x8xf32>
    %88 = arith.truncf %87 : vector<8x1x8xf32> to vector<8x1x8xbf16>
    "tpu.trace_start"() <{level = 10 : i32, message = "bqk,bkd->bqd"}> : () -> ()
    %cst_31 = arith.constant dense<0.000000e+00> : vector<8x1x8xf32>
    %89 = tpu.matmul %88, %76, %cst_31 {dimension_numbers = #tpu.dot_dimension_numbers<[2], [1], [1], [2], [0, 0, 0, 1, 1, 2], [0], [0]>} : vector<8x1x8xbf16>, vector<8x8x8xbf16>, vector<8x1x8xf32> -> vector<8x1x8xf32>
    "tpu.trace_stop"() : () -> ()
    %90 = vector.shape_cast %89 : vector<8x1x8xf32> to vector<8x8xf32>
    %c0_32 = arith.constant 0 : index
    %c24 = arith.constant 24 : index
    %91 = vector.load %arg7[%c0_32, %c24] : memref<8x32xf32, #tpu.memory_space<vmem>>, vector<8x8xf32>
    tpu.vector_store %arg7[%c0_32, %c24], %90 {strides = array<i32>} : memref<8x32xf32, #tpu.memory_space<vmem>>, vector<8x8xf32>,
    return
  }
  func.func @transform_0(%arg0: i32) -> (i32, i32) {
    %c0_i32 = arith.constant 0 : i32
    %c0_i32_0 = arith.constant 0 : i32
    return %arg0, %c0_i32 : i32, i32
  }
  func.func @transform_1(%arg0: i32) -> (i32, i32) {
    %c0_i32 = arith.constant 0 : i32
    %c0_i32_0 = arith.constant 0 : i32
    return %arg0, %c0_i32 : i32, i32
  }
  func.func @transform_2(%arg0: i32) -> (i32, i32) {
    %c0_i32 = arith.constant 0 : i32
    %c0_i32_0 = arith.constant 0 : i32
    %c0_i32_1 = arith.constant 0 : i32
    return %c0_i32, %c0_i32_0 : i32, i32
  }
  func.func @transform_3(%arg0: i32) -> (i32, i32) {
    %c0_i32 = arith.constant 0 : i32
    %c0_i32_0 = arith.constant 0 : i32
    %c0_i32_1 = arith.constant 0 : i32
    return %c0_i32, %c0_i32_0 : i32, i32
  }
  func.func @transform_4(%arg0: i32) -> (i32, i32) {
    %c0_i32 = arith.constant 0 : i32
    %c0_i32_0 = arith.constant 0 : i32
    %c0_i32_1 = arith.constant 0 : i32
    return %c0_i32, %c0_i32_0 : i32, i32
  }
  func.func @transform_5(%arg0: i32) -> (i32, i32) {
    %c0_i32 = arith.constant 0 : i32
    %c0_i32_0 = arith.constant 0 : i32
    %c0_i32_1 = arith.constant 0 : i32
    return %c0_i32, %c0_i32_0 : i32, i32
  }
  func.func @transform_6(%arg0: i32) -> (i32, i32) {
    %c0_i32 = arith.constant 0 : i32
    %c0_i32_0 = arith.constant 0 : i32
    return %arg0, %c0_i32 : i32, i32
  }
}

</mosaic_0001>

<bundles_post_ra>
// kernel: tpu_custom_call.1
= control target key start
LH: loop header
LB: loop body
LE: loop exit
PB: predicated region body
PF: predicated region fallthrough
CT: control target
= control target key end

     0   :  { %11 = vsyncpa [#allocation3], 0  ;;  %s6334_s0 = inlined_call_operand.vmem [shape: bf16[16,32], index: 0, kind: input, shape index: {}]   ;;  %s6335_s1 = inlined_call_operand.vmem [shape: bf16[128,32], index: 1, kind: input, shape index: {}]   ;;  %s6336_s2 = inlined_call_operand.vmem [shape: bf16[64,32], index: 2, kind: input, shape index: {}]   ;;  %s6337_s3 = inlined_call_operand.vmem [shape: f32[1,64], index: 3, kind: input, shape index: {}]   ;;  %s6338_s4 = inlined_call_operand.vmem [shape: bf16[96,32], index: 4, kind: input, shape index: {}]   ;;  %s6339_s5 = inlined_call_operand.vmem [shape: f32[1,96], index: 5, kind: input, shape index: {}]   ;;  %s6340_s6 = inlined_call_operand.hbm [shape: f32[16,32], index: 6, kind: output, shape index: {}]  }
   0x1   :  { %13 = vsyncpa [#allocation3 + $0x1], 0  ;;  %s5308_s21 = smov 0   ;;  %s5310_s22 = smov 0  }
   0x2   :  { %s5312_s23 = smov 0   ;;  %s5314_s24 = smov 0  }
   0x3 LB: > { %s5329_s25 = sadd.s32 4294967295, %s5257_s24   ;;  %s4321_s26 = sadd.s32 4294967294, %s5257_s24   ;;  %s5257_s24 = sphi %s5314_s24, %s6346_s24   ;;  %s5253_s23 = sphi %s5312_s23, %s6345_s23   ;;  %s5249_s22 = sphi %s5310_s22, %s6344_s22   ;;  %s5245_s21 = sphi %s5308_s21, %s6343_s21  }
   0x4   : > { %s5333_s27 = sadd.s32 1, %s5257_s24   ;;  %s162_s28 = sadd.s32 1, %s5253_s23 }
   0x5   : > { %s159_s29 = ssub.s32 %s5257_s24, %s5333_s27  ;;  %p172_p0 = scmp.ne.s32.totalorder %s5253_s23, %s5249_s22 }
   0x6   : > { %p160_p1 = scmp.eq.s32.totalorder %s159_s29, 0  ;;  %p173_p2 = scmp.eq.s32.totalorder %s5329_s25, 1 }
   0x7   : > { %p178_p3 = scmp.ne.s32.totalorder %s5249_s22, %s5245_s21  ;;  %p179_p4 = scmp.eq.s32.totalorder %s4321_s26, 1 }
   0x8   : > { %s5344_s30 = scalar_select %p160_p1, %s5253_s23, %s162_s28  }
   0x9   : > { %p5346_p5 = por %p173_p2, %p172_p0  ;;  %p5350_p6 = por %p179_p4, %p178_p3 }
   0xa   : > { %p4324_p7 = scmp.ge.s32.totalorder %s5257_s24, 1  ;;  %p225_p8 = scmp.lt.s32.totalorder %s5257_s24, 3 }
   0xc   : > { %p226_p9 = pnand %p4324_p7, %p225_p8 }
   0xd   : > { %s4327_s19 = sshll.u32 (!%p226_p9), %s5329_s25, 3  ;;  %p259_p11 = scmp.lt.s32.totalorder (!%p226_p9), %s5329_s25, 1 }
   0xe   : > { %229 = sbr.rel (%p226_p9) target bundleno = 3078 (0xc06), region = 44  ;;  %p264_p10 = scmp.lt.s32.totalorder (!%p226_p9), %s4327_s19, 15 }
   0xf   : > { %s5262_s13 = smov (!%p226_p9), 64   ;;  %s5263_s14 = smov (!%p226_p9), 112  }
  0x10   : > { %s256_s16 = sand.u32 (!%p226_p9), 1, %s5249_s22   ;;  %s5266_s20 = smov (!%p226_p9), 48  }
  0x11   : > { %s4325_s17 = sshll.u32 (!%p226_p9), %s256_s16, 3  ;;  %s5269_s29 = smov (!%p226_p9), 8  }
  0x12   : > { %s5270_s9 = smov (!%p226_p9), 16   ;;  %s5271_s10 = smov (!%p226_p9), 24  }
  0x13   : > { %vm314_vm0 = vcmask 261120   ;;  %v5055_v0 = vld [vmem:[%s6338_s4 + $0x28] sm:$0xff]   ;;  %v5056_v1 = vld [vmem:[%s6338_s4 + $0x20] sm:$0xff]   ;;  %v5259_v3 = vmov 0.0   ;;  %v5057_v4 = vld [vmem:[%s6336_s2 + $0x18] sm:$0xff]   ;;  %vm5260_vm1 = vmmov 0   ;;  %v539_v29 = vlaneseq }
  0x14   : > { %4997 = vmatprep.subr.msk.bf16.mxu1 %vm314_vm0, %v5055_v0  ;;  %v467_v2 = vsel %vm314_vm0, %v5055_v0, 0  ;;  %4581 = vmatprep.subr.bf16.mxu0 %v5259_v3  ;;  %v328_v5 = vsel %vm314_vm0, %v5057_v4, 0  ;;  %v5059_v6 = vld [vmem:[%s6336_s2 + $0x10] sm:$0xff]   ;;  %v464_v7 = vsel %vm314_vm0, %v5056_v1, 0  ;;  %v5058_v8 = vld [vmem:[%s6338_s4 + $0x18] sm:$0xff]   ;;  %s6348_s19 = smov (!%p264_p10, %s4327_s19), 15 }
  0x15   : > { %4594 = vmatpush3.bf16.xpose.msra.mxu1 %v467_v2  ;;  %4582 = vmatpush3.bf16.xpose.msra.mxu0 %v328_v5  ;;  %v325_v9 = vsel %vm314_vm0, %v5059_v6, 0  ;;  %v5061_v10 = vld [vmem:[%s6336_s2 + $0x8] sm:$0xff]   ;;  %s4328_s28 = sshll.u32 %s6348_s19, 2  ;;  %v461_v11 = vsel %vm314_vm0, %v5058_v8, 0  ;;  %v5060_v12 = vld [vmem:[%s6338_s4 + $0x10] sm:$0xff]   ;;  %v5063_v15 = vld [vmem:[%s6336_s2] sm:$0xff]  }
  0x16   : > { %4998 = vmatprep.subr.msk.bf16.mxu1 %vm314_vm0, %v5056_v1  ;;  %4583 = vmatprep.subr.bf16.mxu0 %v5259_v3  ;;  %s5394_s12 = scalar_lea.vmem %s6335_s1, %s4328_s28  ;;  %v322_v14 = vsel %vm314_vm0, %v5061_v10, 0  ;;  %v458_v16 = vsel %vm314_vm0, %v5060_v12, 0  ;;  %v5062_v17 = vld [vmem:[%s6338_s4 + $0x8] sm:$0xff]   ;;  %v319_v18 = vsel %vm314_vm0, %v5063_v15, 0  ;;  %v5064_v20 = vld [vmem:[%s6338_s4] sm:$0xff]   ;;  %v540_v35 = vshrl.u32 %v539_v29, 7 }
  0x17   : > { %4589 = vmatprep.mubr.msk.bf16.mxu0 %vm5260_vm1, %v5259_v3  ;;  %v5065_v13 = vld [vmem:[%s5394_s12] sm:$0xff]   ;;  %s260_s15 = scalar_select %p259_p11, %s5329_s25, 1  ;;  %v455_v19 = vsel %vm314_vm0, %v5062_v17, 0  ;;  %v452_v22 = vsel %vm314_vm0, %v5064_v20, 0  ;;  %v5066_v23 = vld [vmem:[%s5394_s12 + $0x8] sm:$0xff]   ;;  %v5067_v24 = vld [vmem:[%s5394_s12 + $0x10] sm:$0xff]  }
  0x18   : > { %4605 = vmatprep.mubr.msk.bf16.mxu1 %vm314_vm0, %v5065_v13  ;;  %v5068_v25 = vld [vmem:[%s5394_s12 + $0x18] sm:$0xff]   ;;  %v5261_v27 = vmov 1966171168   ;;  %v4329_v30 = vld [vmem:[%s6337_s3] ss:$0 sm:$0xff]  ;;  %v5451_v50 = vsub.s32 0, %v540_v35 }
  0x19   : > { %s4326_s18 = sshll.u32 %s260_s15, 2  ;;  %v537_v28 = vunpack.c.l.s4 %v5261_v27  ;;  %v5440_v39 = vld [vmem:[%s6339_s5] ss:$0 sm:$0xff]  ;;  %vm597_vm2 = vcmask 130048   ;;  %vm1104_vm3 = vcmask 1043456   ;;  %vm1001_vm4 = vcmask 57344  }
  0x1a   : > { %s262_s26 = scalar_lea.vmem %s6334_s0, %s4326_s18  ;;  %s5264_s15 = smov 56   ;;  %vm1100_vm5 = vcmask 64512   ;;  %vm1493_vm6 = vcmask 1041409   ;;  %vm1496_vm7 = vcmask 1042434   ;;  %vm1499_vm8 = vcmask 1043459  }
  0x1b   : > { %v270_v21 = vld [vmem:[%s262_s26] sm:$0xf]  ;;  %v538_v34 = vunpack.c.0.s8 %v537_v28  ;;  %vm1502_vm9 = vcmask 1044484   ;;  %vm1505_vm10 = vcmask 1045509   ;;  %vm1508_vm11 = vcmask 1046534   ;;  %s5773_s18 = scalar_lea.vmem [#allocation2], %s4325_s17 }
  0x1c   : > { %vm1511_vm12 = vcmask 1047559   ;;  %s5265_s19 = smov 96   ;;  %s5267_s26 = smov 80   ;;  %vm2420_vm13 = vcmask 130112   ;;  %vm3327_vm14 = vcmask 195712   ;;  %vm4234_vm15 = vcmask 261312  }
  0x1d   : > { %4596 = vmatpush3.bf16.xpose.msra.mxu1 %v464_v7  ;;  %4584 = vmatpush3.bf16.xpose.msra.mxu0 %v325_v9  ;;  %v541_v38 = vsub.s32 %v538_v34, %v540_v35  ;;  %s5268_s28 = smov 40   ;;  %s4427_s11 = sshll.u32 %s5329_s25, 7 }
  0x1e   : > { %4999 = vmatprep.subr.msk.bf16.mxu1 %vm314_vm0, %v5058_v8  ;;  %4585 = vmatprep.subr.bf16.mxu0 %v5259_v3  ;;  %s4250_s12 = sshll.u32 %s5773_s18, 4  ;;  %s4237_s17 = scalar_lea.sflag [#allocation3], %s256_s16  ;;  %s4251_s12 = int_to_ptr.vmem [resolvable:$true] %s4250_s12 }
  0x25   : > { %4598 = vmatpush3.bf16.xpose.msra.mxu1 %v461_v11  ;;  %4586 = vmatpush3.bf16.xpose.msra.mxu0 %v322_v14 }
  0x26   : > { %5000 = vmatprep.subr.msk.bf16.mxu1 %vm314_vm0, %v5060_v12  ;;  %4587 = vmatprep.subr.bf16.mxu0 %v5259_v3 }
  0x2d   : > { %4600 = vmatpush3.bf16.xpose.msra.mxu1 %v458_v16  ;;  %4588 = vmatpush3.bf16.xpose.msra.mxu0 %v319_v18 }
  0x2e   : > { %5001 = vmatprep.subr.msk.bf16.mxu1 %vm314_vm0, %v5062_v17  ;;  %4613 = vmatprep.subr.bf16.mxu0 %v5259_v3 }
  0x34   : > { %4590 = vmatmul.mubr.msk.bf16.vlgmr.msra.gmra.mxu0 %vm314_vm0, %v270_v21 }
  0x35   : > { %4602 = vmatpush3.bf16.xpose.msra.mxu1 %v455_v19  ;;  %4615 = vmatprep.mubr.msk.bf16.mxu0 %vm5260_vm1, %v5259_v3 }
  0x36   : > { %5002 = vmatprep.subr.msk.bf16.mxu1 %vm314_vm0, %v5064_v20 }
  0x3d   : > { %4604 = vmatpush3.bf16.xpose.msra.mxu1 %v452_v22 }
  0x3e   : > { %4637 = vmatprep.subr.bf16.mxu1 %v5259_v3 }
  0x44   : > { %4606 = vmatmul.mubr.msk.bf16.vlgmr.msra.gmra.mxu1 %vm314_vm0, %v5066_v23 }
  0x45   : > { %4609 = vmatprep.mubr.msk.bf16.mxu1 %vm314_vm0, %v5067_v24 }
  0x4c   : > { %4610 = vmatmul.mubr.msk.bf16.gmra.mxu1 %vm314_vm0, %v5068_v25 }
  0x4d   : > { %4639 = vmatprep.mubr.msk.bf16.mxu1 %vm5260_vm1, %v5259_v3 }
  0xf4   : > { %v364_v26 = vpop.f32.mrf.mxu0 }
  0xf5   : > { %v365_v33 = vadd.f32 %v4329_v30, %v364_v26 }
  0xf6   : > { %v4591_v31 = vpop.f32.mrf.mxu0 }
  0xf7   : > { %v534_v37 = vpack.c.bf16 %v365_v33, %v365_v33 }
  0xf8   : > { %v367_v32 = vpop.f32.mrf.mxu0 }
  0xf9   : > { %v542_v40 = vrot.slane %v534_v37, %v541_v38 }
  0xfa   : > { %v4592_v36 = vpop.f32.mrf.mxu0 }
  0xfb   : > { %v550_v44 = vrot.slane %v542_v40, %v541_v38  ;;  %v543_v61 = vcombine.high %v542_v40, %v542_v40 }
  0xfd   : > { %v4358_v52 = vpack.i.b16 %v550_v44, %v550_v44  ;;  %v558_v62 = vcombine.high %v550_v44, %v550_v44  ;;  %v561_v63 = vunpack.i.h.s16 %v550_v44  ;;  %v557_v5 = vrot.slane %v543_v61, %v541_v38 }
  0xff   : > { %v5464_v58 = vrot.slane %v4358_v52, %v5451_v50  ;;  %v644_v6 = vpack.i.b16 %v561_v63, %v561_v63  ;;  %v4364_v7 = vpack.i.b16 %v558_v62, %v558_v62  ;;  %v559_v9 = vcombine.high %v557_v5, %v557_v5 }
 0x100   : > { %v4361_v15 = vpack.i.b16 %v557_v5, %v557_v5  ;;  %v563_v18 = vunpack.i.h.s16 %v557_v5  ;;  %v565_v25 = vunpack.i.h.s16 %v558_v62 }
 0x101   : > { %v5487_v10 = vrot.slane %v4364_v7, %v5451_v50  ;;  %v5490_v11 = vrot.slane %v644_v6, %v5451_v50  ;;  %v4367_v16 = vpack.i.b16 %v559_v9, %v559_v9  ;;  %v567_v31 = vunpack.i.h.s16 %v559_v9 }
 0x102   : > { %v5507_v19 = vrot.slane %v4361_v15, %v5451_v50  ;;  %v746_v23 = vpack.i.b16 %v563_v18, %v563_v18  ;;  %v848_v29 = vpack.i.b16 %v565_v25, %v565_v25 }
 0x103   : > { %v5510_v20 = vrot.slane %v4367_v16, %v5451_v50  ;;  %v950_v34 = vpack.i.b16 %v567_v31, %v567_v31 }
 0x104   : > { %v4607_v41 = vpop.f32.mrf.mxu1  ;;  %v5528_v27 = vrot.slane %v746_v23, %v5451_v50  ;;  %v5540_v32 = vrot.slane %v848_v29, %v5451_v50 }
 0x105   : > { %v512_v42 = vadd.f32 %v4607_v41, %v5440_v39  ;;  %v5550_v35 = vrot.slane %v950_v34, %v5451_v50 }
 0x106   : > { %v503_v43 = vpop.f32.mrf.mxu1 }
 0x107   : > { %v5443_v45 = vpack.c.bf16 %v512_v42, %v512_v42  ;;  %v504_v46 = vadd.f32 %v5440_v39, %v503_v43 }
 0x108   : > { %v4608_v47 = vpop.f32.mrf.mxu1 }
 0x109   : > { %v5446_v48 = vpack.c.bf16 %v504_v46, %v504_v46  ;;  %v515_v49 = vadd.f32 %v4608_v47, %v5440_v39  ;;  %1196 = vrot.lane.b32.xlu1 %v5443_v45, %s5262_s13  ;;  %v704_v14 = vsel %vm597_vm2, %v5443_v45, 0 }
 0x10a   : > { %v506_v51 = vpop.f32.mrf.mxu1 }
 0x10b   : > { %v5453_v53 = vpack.c.bf16 %v515_v49, %v515_v49  ;;  %v507_v54 = vadd.f32 %v5440_v39, %v506_v51  ;;  %1098 = vrot.lane.b32.xlu0 %v5446_v48, %s5262_s13  ;;  %v602_v55 = vsel %vm597_vm2, %v5446_v48, 0 }
 0x10c   : > { %v4611_v56 = vpop.f32.mrf.mxu1  ;;  %4614 = vmatpush3.bf16.xpose.msra.mxu0 %v602_v55 }
 0x10d   : > { %1244 = vrot.lane.b32.xlu1 %v5453_v53, %s5262_s13  ;;  %4619 = vmatprep.subr.bf16.mxu0 %v5259_v3  ;;  %v5466_v59 = vpack.c.bf16 %v507_v54, %v507_v54  ;;  %v528_v0 = vadd.f32 %v4611_v56, %v5440_v39  ;;  %v755_v22 = vsel %vm597_vm2, %v5453_v53, 0 }
 0x10e   : > { %v519_v57 = vpop.f32.mrf.mxu1 }
 0x10f   : > { %v520_v60 = vadd.f32 %v5440_v39, %v519_v57  ;;  %v653_v2 = vsel %vm597_vm2, %v5466_v59, 0  ;;  %v5480_v8 = vpack.c.bf16 %v528_v0, %v528_v0 }
 0x110   : > { %v4612_v13 = vpop.f32.mrf.mxu1 }
 0x111   : > { %v5470_v1 = vpack.c.bf16 %v520_v60, %v520_v60  ;;  %1148 = vrot.lane.b32.xlu1 %v5466_v59, %s5262_s13  ;;  %v908_v12 = vsel %vm597_vm2, %v5480_v8, 0  ;;  %v531_v26 = vadd.f32 %v4612_v13, %v5440_v39 }
 0x112   : > { %v522_v17 = vpop.f32.mrf.mxu1 }
 0x113   : > { %4616 = vmatmul.mubr.msk.bf16.vlgmr.msra.gmra.mxu0 %vm597_vm2, %v5464_v58  ;;  %v806_v4 = vsel %vm597_vm2, %v5470_v1, 0  ;;  %v523_v21 = vadd.f32 %v5440_v39, %v522_v17  ;;  %v5536_v30 = vpack.c.bf16 %v531_v26, %v531_v26 }
 0x114   : > { %4620 = vmatpush3.bf16.xpose.msra.mxu0 %v653_v2  ;;  %4638 = vmatpush3.bf16.xpose.msra.mxu1 %v806_v4 }
 0x115   : > { %4621 = vmatprep.mubr.msk.bf16.mxu0 %vm5260_vm1, %v5259_v3  ;;  %4625 = vmatprep.subr.bf16.mxu0 %v5259_v3  ;;  %v5521_v24 = vpack.c.bf16 %v523_v21, %v523_v21  ;;  %v959_v33 = vsel %vm597_vm2, %v5536_v30, 0 }
 0x116   : > { %4649 = vmatprep.subr.bf16.mxu1 %v5259_v3 }
 0x117   : > { %v857_v28 = vsel %vm597_vm2, %v5521_v24, 0 }
 0x11b   : > { %4622 = vmatmul.mubr.msk.bf16.vlgmr.msra.gmra.mxu0 %vm597_vm2, %v5490_v11  ;;  %4640 = vmatmul.mubr.msk.bf16.vlgmr.msra.gmra.mxu1 %vm597_vm2, %v5487_v10 }
 0x11c   : > { %4626 = vmatpush3.bf16.xpose.msra.mxu0 %v704_v14  ;;  %4650 = vmatpush3.bf16.xpose.msra.mxu1 %v908_v12 }
 0x11d   : > { %4627 = vmatprep.mubr.msk.bf16.mxu0 %vm5260_vm1, %v5259_v3  ;;  %4651 = vmatprep.mubr.msk.bf16.mxu1 %vm5260_vm1, %v5259_v3 }
 0x11e   : > { %4631 = vmatprep.subr.bf16.mxu0 %v5259_v3  ;;  %4661 = vmatprep.subr.bf16.mxu1 %v5259_v3 }
 0x123   : > { %4628 = vmatmul.mubr.msk.bf16.vlgmr.msra.gmra.mxu0 %vm597_vm2, %v5507_v19  ;;  %4652 = vmatmul.mubr.msk.bf16.vlgmr.msra.gmra.mxu1 %vm597_vm2, %v5510_v20 }
 0x124   : > { %4632 = vmatpush3.bf16.xpose.msra.mxu0 %v755_v22  ;;  %4633 = vmatprep.mubr.msk.bf16.mxu0 %vm5260_vm1, %v5259_v3 }
 0x125   : > { %4643 = vmatprep.subr.bf16.mxu0 %v5259_v3  ;;  %4663 = vmatprep.mubr.msk.bf16.mxu1 %vm5260_vm1, %v5259_v3 }
 0x12b   : > { %4634 = vmatmul.mubr.msk.bf16.vlgmr.msra.gmra.mxu0 %vm597_vm2, %v5528_v27 }
 0x12c   : > { %4644 = vmatpush3.bf16.xpose.msra.mxu0 %v857_v28  ;;  %4645 = vmatprep.mubr.msk.bf16.mxu0 %vm5260_vm1, %v5259_v3 }
 0x12d   : > { %4655 = vmatprep.subr.bf16.mxu0 %v5259_v3 }
 0x133   : > { %4646 = vmatmul.mubr.msk.bf16.vlgmr.msra.gmra.mxu0 %vm597_vm2, %v5540_v32 }
 0x134   : > { %4656 = vmatpush3.bf16.xpose.msra.mxu0 %v959_v33  ;;  %4657 = vmatprep.mubr.msk.bf16.mxu0 %vm5260_vm1, %v5259_v3 }
 0x135   : > { %4667 = vmatprep.subr.bf16.mxu0 %v5259_v3 }
 0x13b   : > { %4658 = vmatmul.mubr.msk.bf16.vlgmr.msra.gmra.mxu0 %vm597_vm2, %v5550_v35 }
 0x13c   : > { %4669 = vmatprep.mubr.msk.bf16.mxu0 %vm5260_vm1, %v5259_v3 }
 0x17b   : > { %v5556_v36 = vpop.permute.xlu1 %1196 }
 0x17d   : > { %v1099_v37 = vpop.permute.xlu0 %1098 }
 0x17e   : > { %v1106_v38 = vsel %vm1104_vm3, %v1099_v37, 0 }
 0x17f   : > { %v5559_v39 = vpop.permute.xlu1 %1244  ;;  %4662 = vmatpush3.bf16.msra.mxu1 %v1106_v38 }
 0x180   : > { %4673 = vmatprep.subr.bf16.mxu1 %v5259_v3 }
 0x183   : > { %v1149_v40 = vpop.permute.xlu1 %1148 }
 0x184   : > { %v1154_v41 = vsel %vm1104_vm3, %v1149_v40, 0 }
 0x185   : > { %4668 = vmatpush3.bf16.msra.mxu0 %v1154_v41 }
 0x186   : > { %4679 = vmatprep.subr.bf16.mxu0 %v5259_v3 }
 0x1d3   : > { %v638_v42 = vpop.f32.mrf.mxu0 }
 0x1d4   : > { %v1002_v43 = vsel %vm1001_vm4, %v638_v42, -inf }
 0x1d5   : > { %1003 = vmax.xlane.f32.xlu0 %v1002_v43  ;;  %v4617_v44 = vpop.f32.mrf.mxu0 }
 0x1d7   : > { %v641_v46 = vpop.f32.mrf.mxu0 }
 0x1d9   : > { %v4618_v47 = vpop.f32.mrf.mxu0 }
 0x1db   : > { %v689_v49 = vpop.f32.mrf.mxu0  ;;  %v842_v50 = vpop.f32.mrf.mxu1 }
 0x1dc   : > { %v1005_v51 = vsel %vm1001_vm4, %v689_v49, -inf  ;;  %v1014_v57 = vsel %vm1001_vm4, %v842_v50, -inf }
 0x1dd   : > { %v4641_v52 = vpop.f32.mrf.mxu1  ;;  %1006 = vmax.xlane.f32.xlu0 %v1005_v51  ;;  %v4623_v54 = vpop.f32.mrf.mxu0 }
 0x1df   : > { %v692_v55 = vpop.f32.mrf.mxu0  ;;  %v845_v56 = vpop.f32.mrf.mxu1 }
 0x1e1   : > { %v4642_v60 = vpop.f32.mrf.mxu1  ;;  %1015 = vmax.xlane.f32.xlu0 %v1014_v57  ;;  %v4624_v61 = vpop.f32.mrf.mxu0 }
 0x1e3   : > { %v740_v62 = vpop.f32.mrf.mxu0  ;;  %v5567_v63 = vpop.f32.mrf.mxu1 }
 0x1e4   : > { %v1020_v0 = vsel %vm1001_vm4, %v5567_v63, -inf  ;;  %v1008_v2 = vsel %vm1001_vm4, %v740_v62, -inf }
 0x1e5   : > { %v4653_v4 = vpop.f32.mrf.mxu1  ;;  %1021 = vmax.xlane.f32.xlu0 %v1020_v0  ;;  %1009 = vmax.xlane.f32.xlu1 %v1008_v2  ;;  %v4629_v5 = vpop.f32.mrf.mxu0 }
 0x1e7   : > { %v743_v6 = vpop.f32.mrf.mxu0  ;;  %v947_v7 = vpop.f32.mrf.mxu1 }
 0x1e9   : > { %v4630_v9 = vpop.f32.mrf.mxu0  ;;  %v4654_v12 = vpop.f32.mrf.mxu1 }
 0x1eb   : > { %v791_v13 = vpop.f32.mrf.mxu0 }
 0x1ec   : > { %v1011_v29 = vsel %vm1001_vm4, %v791_v13, -inf }
 0x1ed   : > { %v4635_v14 = vpop.f32.mrf.mxu0 }
 0x1ef   : > { %v794_v15 = vpop.f32.mrf.mxu0 }
 0x1f1   : > { %v4636_v16 = vpop.f32.mrf.mxu0 }
 0x1f3   : > { %v893_v17 = vpop.f32.mrf.mxu0 }
 0x1f4   : > { %v1017_v31 = vsel %vm1001_vm4, %v893_v17, -inf }
 0x1f5   : > { %v4647_v18 = vpop.f32.mrf.mxu0 }
 0x1f6   : > { %1340 = vrot.lane.b32.xlu1 %v5521_v24, %s5262_s13 }
 0x1f7   : > { %v896_v21 = vpop.f32.mrf.mxu0 }
 0x1f9   : > { %v4648_v22 = vpop.f32.mrf.mxu0 }
 0x1fb   : > { %1292 = vrot.lane.b32.xlu0 %v5470_v1, %s5262_s13  ;;  %v5576_v23 = vpop.f32.mrf.mxu0 }
 0x1fc   : > { %v1023_v33 = vsel %vm1001_vm4, %v5576_v23, -inf }
 0x1fd   : > { %v4659_v25 = vpop.f32.mrf.mxu0 }
 0x1ff   : > { %v998_v26 = vpop.f32.mrf.mxu0 }
 0x201   : > { %v4660_v28 = vpop.f32.mrf.mxu0 }
 0x21a   : > { %1012 = vmax.xlane.f32.xlu1 %v1011_v29 }
 0x21e   : > { %1018 = vmax.xlane.f32.xlu1 %v1017_v31 }
 0x222   : > { %1024 = vmax.xlane.f32.xlu1 %v1023_v33 }
 0x25e   : > { %v1004_v34 = vpop.xlane.xlu0 %1003 }
 0x25f   : > { %v1026_v37 = vsub.f32 %v638_v42, %v1004_v34 }
 0x261   : > { %v1034_v38 = vmul.f32 1.442695, %v1026_v37 }
 0x263   : > { %5069 = vpow2.f32 %v1034_v38 }
 0x266   : > { %v1007_v40 = vpop.xlane.xlu0 %1006 }
 0x267   : > { %v1027_v41 = vsub.f32 %v689_v49, %v1007_v40 }
 0x269   : > { %v1036_v43 = vmul.f32 1.442695, %v1027_v41  ;;  %v1202_v41 = vsel %vm1104_vm3, %v5556_v36, 0  ;;  %v1250_v36 = vsel %vm1104_vm3, %v5559_v39, 0 }
 0x26a   : > { %v1016_v44 = vpop.xlane.xlu0 %1015 }
 0x26b   : > { %5071 = vpow2.f32 %v1036_v43  ;;  %v1030_v46 = vsub.f32 %v842_v50, %v1016_v44 }
 0x26d   : > { %v1042_v47 = vmul.f32 1.442695, %v1030_v46 }
 0x26e   : > { %v1010_v51 = vpop.xlane.xlu1 %1009 }
 0x26f   : > { %5073 = vpow2.f32 %v1042_v47  ;;  %v1028_v52 = vsub.f32 %v740_v62, %v1010_v51  ;;  %v1022_v62 = vpop.xlane.xlu0 %1021 }
 0x270   : > { %v5582_v54 = vpop.eup %5069  ;;  %v1032_v0 = vsub.f32 %v5567_v63, %v1022_v62 }
 0x271   : > { %v1038_v55 = vmul.f32 1.442695, %v1028_v52  ;;  %v1050_v56 = vsel %vm1001_vm4, %v5582_v54, 0.0 }
 0x272   : > { %1051 = vadd.xlane.f32.xlu0 %v1050_v56  ;;  %v5603_v2 = vpop.permute.xlu1 %1340  ;;  %v1046_v4 = vmul.f32 1.442695, %v1032_v0 }
 0x273   : > { %5075 = vpow2.f32 %v1038_v55  ;;  %v1293_v28 = vpop.permute.xlu0 %1292 }
 0x274   : > { %5077 = vpow2.f32 %v1046_v4  ;;  %v1298_v39 = vsel %vm1104_vm3, %v1293_v28, 0 }
 0x278   : > { %v5586_v42 = vpop.eup %5071 }
 0x279   : > { %v1053_v49 = vsel %vm1001_vm4, %v5586_v42, 0.0 }
 0x27a   : > { %1054 = vadd.xlane.f32.xlu1 %v1053_v49 }
 0x27c   : > { %v5590_v57 = vpop.eup %5073 }
 0x27d   : > { %v1062_v50 = vsel %vm1001_vm4, %v5590_v57, 0.0 }
 0x27e   : > { %1063 = vadd.xlane.f32.xlu0 %v1062_v50 }
 0x280   : > { %v5594_v60 = vpop.eup %5075 }
 0x281   : > { %v1056_v61 = vsel %vm1001_vm4, %v5594_v60, 0.0  ;;  %v5605_v15 = vpop.eup %5077 }
 0x282   : > { %1057 = vadd.xlane.f32.xlu0 %v1056_v61  ;;  %v1068_v63 = vsel %vm1001_vm4, %v5605_v15, 0.0 }
 0x28b   : > { %1436 = vrot.lane.b32.xlu1 %v5536_v30, %s5262_s13 }
 0x298   : > { %1388 = vrot.lane.b32.xlu0 %v5480_v8, %s5262_s13 }
 0x2a3   : > { %v1013_v5 = vpop.xlane.xlu1 %1012 }
 0x2a4   : > { %v1029_v6 = vsub.f32 %v791_v13, %v1013_v5 }
 0x2a6   : > { %v1040_v7 = vmul.f32 1.442695, %v1029_v6 }
 0x2a7   : > { %v1019_v9 = vpop.xlane.xlu1 %1018 }
 0x2a8   : > { %5079 = vpow2.f32 %v1040_v7  ;;  %v1031_v12 = vsub.f32 %v893_v17, %v1019_v9 }
 0x2aa   : > { %v1044_v14 = vmul.f32 1.442695, %v1031_v12 }
 0x2ab   : > { %v1025_v17 = vpop.xlane.xlu1 %1024 }
 0x2ac   : > { %5081 = vpow2.f32 %v1044_v14  ;;  %v1033_v22 = vsub.f32 %v5576_v23, %v1025_v17  ;;  %v1346_v14 = vsel %vm1104_vm3, %v5603_v2, 0 }
 0x2ae   : > { %v1048_v25 = vmul.f32 1.442695, %v1033_v22 }
 0x2b0   : > { %5083 = vpow2.f32 %v1048_v25 }
 0x2b5   : > { %v5607_v16 = vpop.eup %5079 }
 0x2b6   : > { %v1059_v18 = vsel %vm1001_vm4, %v5607_v16, 0.0 }
 0x2b7   : > { %1060 = vadd.xlane.f32.xlu1 %v1059_v18  ;;  %1069 = vadd.xlane.f32.xlu0 %v1068_v63 }
 0x2b9   : > { %v5613_v13 = vpop.eup %5081 }
 0x2ba   : > { %v1065_v21 = vsel %vm1001_vm4, %v5613_v13, 0.0 }
 0x2bb   : > { %1066 = vadd.xlane.f32.xlu1 %v1065_v21 }
 0x2bd   : > { %v5636_v26 = vpop.eup %5083 }
 0x2be   : > { %v1071_v23 = vsel %vm1001_vm4, %v5636_v26, 0.0 }
 0x2cc   : > { %1567 = vrot.lane.b32.xlu1 %v5466_v59, %s5263_s14 }
 0x2cd   : > { %1517 = vrot.lane.b32.xlu0 %v5446_v48, %s5263_s14 }
 0x2d1   : > { %1515 = vrot.lane.b32.xlu0 %v5464_v58, %s5263_s14 }
 0x2d5   : > { %1565 = vrot.lane.b32.xlu0 %v5490_v11, %s5263_s14 }
 0x2d9   : > { %1615 = vrot.lane.b32.xlu0 %v5507_v19, %s5263_s14 }
 0x2dd   : > { %1665 = vrot.lane.b32.xlu0 %v5528_v27, %s5263_s14 }
 0x2e1   : > { %1715 = vrot.lane.b32.xlu0 %v5487_v10, %s5263_s14 }
 0x2e5   : > { %1765 = vrot.lane.b32.xlu0 %v5540_v32, %s5263_s14 }
 0x2e9   : > { %1815 = vrot.lane.b32.xlu0 %v5510_v20, %s5263_s14 }
 0x2ed   : > { %2011 = vrot.lane.b32.xlu0 %v5446_v48, %s5264_s15 }
 0x2f0   : > { %1072 = vadd.xlane.f32.xlu1 %v1071_v23 }
 0x2fb   : > { %v1052_v29 = vpop.xlane.xlu0 %1051 }
 0x2fc   : > { %5085 = vrcp.f32 %v1052_v29 }
 0x301   : > { %1617 = vrot.lane.b32.xlu1 %v5443_v45, %s5263_s14 }
 0x303   : > { %v1055_v31 = vpop.xlane.xlu1 %1054 }
 0x304   : > { %5087 = vrcp.f32 %v1055_v31 }
 0x305   : > { %1667 = vrot.lane.b32.xlu1 %v5453_v53, %s5263_s14 }
 0x307   : > { %v1064_v33 = vpop.xlane.xlu0 %1063  ;;  %v1437_v50 = vpop.permute.xlu1 %1436 }
 0x309   : > { %v5086_v34 = vpop.eup %5085  ;;  %1717 = vrot.lane.b32.xlu1 %v5470_v1, %s5263_s14 }
 0x30a   : > { %v1082_v37 = vmul.f32 %v5086_v34, %v5582_v54 }
 0x30b   : > { %v1058_v38 = vpop.xlane.xlu0 %1057 }
 0x30c   : > { %v1090_v40 = vpack.c.bf16 %v1082_v37, %v1082_v37  ;;  %5089 = vrcp.f32 %v1058_v38 }
 0x30d   : > { %1767 = vrot.lane.b32.xlu1 %v5521_v24, %s5263_s14  ;;  %5091 = vrcp.f32 %v1064_v33 }
 0x30e   : > { %4664 = vmatmul.mubr.msk.bf16.vlgmr.msra.gmra.mxu1 %vm1100_vm5, %v1090_v40 }
 0x30f   : > { %4674 = vmatpush3.bf16.msra.mxu1 %v1202_v41  ;;  %4675 = vmatprep.mubr.msk.bf16.mxu1 %vm5260_vm1, %v5259_v3  ;;  %v1389_v56 = vpop.permute.xlu0 %1388 }
 0x310   : > { %4685 = vmatprep.subr.bf16.mxu1 %v5259_v3  ;;  %v1394_v49 = vsel %vm1104_vm3, %v1389_v56, 0 }
 0x311   : > { %v5088_v43 = vpop.eup %5087  ;;  %1817 = vrot.lane.b32.xlu1 %v5480_v8, %s5263_s14 }
 0x312   : > { %v1083_v44 = vmul.f32 %v5088_v43, %v5586_v42 }
 0x314   : > { %v1091_v46 = vpack.c.bf16 %v1083_v44, %v1083_v44 }
 0x315   : > { %1867 = vrot.lane.b32.xlu1 %v5536_v30, %s5263_s14 }
 0x316   : > { %4670 = vmatmul.mubr.msk.bf16.vlgmr.msra.gmra.mxu0 %vm1100_vm5, %v1091_v46 }
 0x317   : > { %4680 = vmatpush3.bf16.msra.mxu0 %v1250_v36  ;;  %4681 = vmatprep.mubr.msk.bf16.mxu0 %vm5260_vm1, %v5259_v3 }
 0x318   : > { %4691 = vmatprep.subr.bf16.mxu0 %v5259_v3 }
 0x319   : > { %1865 = vrot.lane.b32.xlu1 %v5550_v35, %s5263_s14  ;;  %v5090_v47 = vpop.eup %5089 }
 0x31a   : > { %v1084_v51 = vmul.f32 %v5090_v47, %v5594_v60  ;;  %v5092_v54 = vpop.eup %5091 }
 0x31b   : > { %v1086_v55 = vmul.f32 %v5092_v54, %v5590_v57 }
 0x31c   : > { %v1092_v52 = vpack.c.bf16 %v1084_v51, %v1084_v51 }
 0x31d   : > { %2059 = vrot.lane.b32.xlu1 %v5466_v59, %s5264_s15  ;;  %v1094_v42 = vpack.c.bf16 %v1086_v55, %v1086_v55 }
 0x31e   : > { %4676 = vmatmul.mubr.msk.bf16.vlgmr.msra.gmra.mxu1 %vm1100_vm5, %v1092_v52 }
 0x31f   : > { %4686 = vmatpush3.bf16.msra.mxu1 %v1298_v39  ;;  %4687 = vmatprep.mubr.msk.bf16.mxu1 %vm5260_vm1, %v5259_v3 }
 0x320   : > { %4697 = vmatprep.subr.bf16.mxu1 %v5259_v3 }
 0x321   : > { %2107 = vrot.lane.b32.xlu1 %v5443_v45, %s5264_s15 }
 0x325   : > { %2155 = vrot.lane.b32.xlu1 %v5453_v53, %s5264_s15 }
 0x326   : > { %4688 = vmatmul.mubr.msk.bf16.vlgmr.msra.gmra.mxu1 %vm1100_vm5, %v1094_v42 }
 0x327   : > { %4698 = vmatpush3.bf16.msra.mxu1 %v1394_v49  ;;  %4699 = vmatprep.mubr.msk.bf16.mxu1 %vm5260_vm1, %v5259_v3 }
 0x328   : > { %4709 = vmatprep.subr.bf16.mxu1 %v5259_v3 }
 0x340   : > { %v1061_v60 = vpop.xlane.xlu1 %1060  ;;  %v1070_v61 = vpop.xlane.xlu0 %1069 }
 0x341   : > { %5093 = vrcp.f32 %v1061_v60 }
 0x342   : > { %5095 = vrcp.f32 %v1070_v61 }
 0x344   : > { %v1067_v57 = vpop.xlane.xlu1 %1066  ;;  %v1518_v6 = vpop.permute.xlu0 %1517 }
 0x345   : > { %5097 = vrcp.f32 %v1067_v57  ;;  %v1523_v18 = vsel %vm597_vm2, %v1518_v6, 0 }
 0x348   : > { %v1516_v63 = vpop.permute.xlu0 %1515  ;;  %v1568_v21 = vpop.permute.xlu1 %1567 }
 0x349   : > { %v1573_v44 = vsel %vm597_vm2, %v1568_v21, 0 }
 0x34e   : > { %v5094_v62 = vpop.eup %5093 }
 0x34f   : > { %v5096_v0 = vpop.eup %5095  ;;  %v1085_v4 = vmul.f32 %v5094_v62, %v5607_v16  ;;  %v1442_v16 = vsel %vm1104_vm3, %v1437_v50, 0 }
 0x350   : > { %v1088_v5 = vmul.f32 %v5096_v0, %v5605_v15 }
 0x351   : > { %v1093_v7 = vpack.c.bf16 %v1085_v4, %v1085_v4 }
 0x352   : > { %v5098_v9 = vpop.eup %5097  ;;  %v1096_v12 = vpack.c.bf16 %v1088_v5, %v1088_v5 }
 0x353   : > { %4682 = vmatmul.mubr.msk.bf16.vlgmr.msra.gmra.mxu0 %vm1100_vm5, %v1093_v7  ;;  %v1087_v15 = vmul.f32 %v5098_v9, %v5613_v13  ;;  %v1566_v13 = vpop.permute.xlu0 %1565 }
 0x354   : > { %4692 = vmatpush3.bf16.msra.mxu0 %v1346_v14  ;;  %4700 = vmatmul.mubr.msk.bf16.vlgmr.msra.gmra.mxu1 %vm1100_vm5, %v1096_v12 }
 0x355   : > { %4710 = vmatpush3.bf16.xpose.msra.mxu1 %v1523_v18  ;;  %4693 = vmatprep.mubr.msk.bf16.mxu0 %vm5260_vm1, %v5259_v3  ;;  %v1095_v2 = vpack.c.bf16 %v1087_v15, %v1087_v15 }
 0x356   : > { %4703 = vmatprep.subr.bf16.mxu0 %v5259_v3  ;;  %4711 = vmatprep.mubr.msk.bf16.mxu1 %vm5260_vm1, %v5259_v3 }
 0x357   : > { %4721 = vmatprep.subr.bf16.mxu1 %v5259_v3  ;;  %v1616_v17 = vpop.permute.xlu0 %1615 }
 0x35b   : > { %4694 = vmatmul.mubr.msk.bf16.vlgmr.msra.gmra.mxu0 %vm1100_vm5, %v1095_v2  ;;  %v1666_v25 = vpop.permute.xlu0 %1665 }
 0x35c   : > { %4704 = vmatpush3.bf16.msra.mxu0 %v1442_v16  ;;  %4712 = vmatmul.mubr.msk.bf16.vlgmr.msra.gmra.mxu1 %vm597_vm2, %v1516_v63 }
 0x35d   : > { %4723 = vmatprep.mubr.msk.bf16.mxu1 %vm5260_vm1, %v5259_v3  ;;  %4705 = vmatprep.mubr.msk.bf16.mxu0 %vm5260_vm1, %v5259_v3 }
 0x35e   : > { %4715 = vmatprep.subr.bf16.mxu0 %v5259_v3 }
 0x35f   : > { %v1716_v29 = vpop.permute.xlu0 %1715 }
 0x363   : > { %v1766_v38 = vpop.permute.xlu0 %1765 }
 0x367   : > { %v1816_v46 = vpop.permute.xlu0 %1815 }
 0x379   : > { %v1073_v22 = vpop.xlane.xlu1 %1072 }
 0x37a   : > { %5099 = vrcp.f32 %v1073_v22 }
 0x37d   : > { %v1618_v23 = vpop.permute.xlu1 %1617 }
 0x37e   : > { %v1623_v28 = vsel %vm597_vm2, %v1618_v23, 0 }
 0x37f   : > { %4722 = vmatpush3.bf16.xpose.msra.mxu1 %v1623_v28 }
 0x380   : > { %4733 = vmatprep.subr.bf16.mxu1 %v5259_v3 }
 0x381   : > { %v1668_v31 = vpop.permute.xlu1 %1667 }
 0x382   : > { %v1673_v51 = vsel %vm597_vm2, %v1668_v31, 0 }
 0x385   : > { %v1718_v33 = vpop.permute.xlu1 %1717 }
 0x386   : > { %v1723_v34 = vsel %vm597_vm2, %v1718_v33, 0  ;;  %4724 = vmatmul.mubr.msk.bf16.vlgmr.msra.gmra.mxu1 %vm597_vm2, %v1616_v17 }
 0x387   : > { %v5100_v37 = vpop.eup %5099  ;;  %4734 = vmatpush3.bf16.xpose.msra.mxu1 %v1723_v34  ;;  %4735 = vmatprep.mubr.msk.bf16.mxu1 %vm5260_vm1, %v5259_v3 }
 0x388   : > { %v1089_v40 = vmul.f32 %v5100_v37, %v5636_v26  ;;  %4745 = vmatprep.subr.bf16.mxu1 %v5259_v3  ;;  %v2012_v26 = vpop.permute.xlu0 %2011 }
 0x389   : > { %v1768_v41 = vpop.permute.xlu1 %1767  ;;  %v2017_v52 = vsel %vm1104_vm3, %v2012_v26, 0 }
 0x38a   : > { %v1097_v43 = vpack.c.bf16 %v1089_v40, %v1089_v40  ;;  %v1773_v54 = vsel %vm597_vm2, %v1768_v41, 0 }
 0x38c   : > { %4706 = vmatmul.mubr.msk.bf16.vlgmr.msra.gmra.mxu0 %vm1100_vm5, %v1097_v43 }
 0x38d   : > { %4716 = vmatpush3.bf16.xpose.msra.mxu0 %v1573_v44  ;;  %v1818_v36 = vpop.permute.xlu1 %1817  ;;  %4717 = vmatprep.mubr.msk.bf16.mxu0 %vm5260_vm1, %v5259_v3 }
 0x38e   : > { %v1823_v47 = vsel %vm597_vm2, %v1818_v36, 0  ;;  %4736 = vmatmul.mubr.msk.bf16.vlgmr.msra.gmra.mxu1 %vm597_vm2, %v1716_v29  ;;  %4727 = vmatprep.subr.bf16.mxu0 %v5259_v3 }
 0x38f   : > { %4746 = vmatpush3.bf16.xpose.msra.mxu1 %v1823_v47  ;;  %4747 = vmatprep.mubr.msk.bf16.mxu1 %vm5260_vm1, %v5259_v3 }
 0x390   : > { %4757 = vmatprep.subr.bf16.mxu1 %v5259_v3 }
 0x391   : > { %v1868_v39 = vpop.permute.xlu1 %1867 }
 0x392   : > { %v1873_v56 = vsel %vm597_vm2, %v1868_v39, 0 }
 0x394   : > { %4718 = vmatmul.mubr.msk.bf16.vlgmr.msra.gmra.mxu0 %vm597_vm2, %v1566_v13 }
 0x395   : > { %4728 = vmatpush3.bf16.xpose.msra.mxu0 %v1673_v51  ;;  %4729 = vmatprep.mubr.msk.bf16.mxu0 %vm5260_vm1, %v5259_v3  ;;  %v1866_v55 = vpop.permute.xlu1 %1865 }
 0x396   : > { %4748 = vmatmul.mubr.msk.bf16.vlgmr.msra.gmra.mxu1 %vm597_vm2, %v1816_v46  ;;  %4739 = vmatprep.subr.bf16.mxu0 %v5259_v3 }
 0x397   : > { %4758 = vmatpush3.bf16.msra.mxu1 %v2017_v52  ;;  %4759 = vmatprep.mubr.msk.bf16.mxu1 %vm5260_vm1, %v5259_v3 }
 0x398   : > { %4769 = vmatprep.subr.bf16.mxu1 %v5259_v3 }
 0x399   : > { %v2060_v42 = vpop.permute.xlu1 %2059 }
 0x39a   : > { %v2065_v49 = vsel %vm1104_vm3, %v2060_v42, 0 }
 0x39c   : > { %4730 = vmatmul.mubr.msk.bf16.vlgmr.msra.gmra.mxu0 %vm597_vm2, %v1666_v25 }
 0x39d   : > { %4740 = vmatpush3.bf16.xpose.msra.mxu0 %v1773_v54  ;;  %4741 = vmatprep.mubr.msk.bf16.mxu0 %vm5260_vm1, %v5259_v3 }
 0x39e   : > { %4751 = vmatprep.subr.bf16.mxu0 %v5259_v3 }
 0x3a4   : > { %4742 = vmatmul.mubr.msk.bf16.vlgmr.msra.gmra.mxu0 %vm597_vm2, %v1766_v38 }
 0x3a5   : > { %4752 = vmatpush3.bf16.xpose.msra.mxu0 %v1873_v56  ;;  %4753 = vmatprep.mubr.msk.bf16.mxu0 %vm5260_vm1, %v5259_v3 }
 0x3a6   : > { %4763 = vmatprep.subr.bf16.mxu0 %v5259_v3 }
 0x3ac   : > { %4754 = vmatmul.mubr.msk.bf16.vlgmr.msra.gmra.mxu0 %vm597_vm2, %v1866_v55 }
 0x3ad   : > { %4764 = vmatpush3.bf16.msra.mxu0 %v2065_v49  ;;  %4765 = vmatprep.mubr.msk.bf16.mxu0 %vm5260_vm1, %v5259_v3 }
 0x3ae   : > { %4775 = vmatprep.subr.bf16.mxu0 %v5259_v3 }
 0x3ce   : > { %v1142_v50 = vpop.f32.mrf.mxu1 }
 0x3d0   : > { %v4665_v60 = vpop.f32.mrf.mxu1 }
 0x3d2   : > { %v1145_v61 = vpop.f32.mrf.mxu1 }
 0x3d4   : > { %v4666_v57 = vpop.f32.mrf.mxu1 }
 0x3d6   : > { %v1190_v62 = vpop.f32.mrf.mxu0 }
 0x3d7   : > { %v1492_v0 = vrot.slane %v1190_v62, 7 }
 0x3d8   : > { %v4671_v4 = vpop.f32.mrf.mxu0 }
 0x3d9   : > { %v1494_v5 = vsel %vm1493_vm6, %v1492_v0, %v1142_v50 }
 0x3da   : > { %v1193_v6 = vpop.f32.mrf.mxu0 }
 0x3dc   : > { %v4672_v7 = vpop.f32.mrf.mxu0 }
 0x3de   : > { %v1238_v9 = vpop.f32.mrf.mxu1 }
 0x3df   : > { %v1495_v12 = vrot.slane %v1238_v9, 6 }
 0x3e0   : > { %v4677_v14 = vpop.f32.mrf.mxu1 }
 0x3e1   : > { %v1497_v18 = vsel %vm1496_vm7, %v1495_v12, %v1494_v5 }
 0x3e2   : > { %v1241_v15 = vpop.f32.mrf.mxu1 }
 0x3e4   : > { %v4678_v2 = vpop.f32.mrf.mxu1 }
 0x3e6   : > { %v1334_v16 = vpop.f32.mrf.mxu1 }
 0x3e7   : > { %v1501_v23 = vrot.slane %v1334_v16, 4 }
 0x3e8   : > { %v4689_v63 = vpop.f32.mrf.mxu1 }
 0x3ea   : > { %v1337_v13 = vpop.f32.mrf.mxu1 }
 0x3ec   : > { %v4690_v21 = vpop.f32.mrf.mxu1 }
 0x413   : > { %v1286_v17 = vpop.f32.mrf.mxu0 }
 0x414   : > { %v1498_v22 = vrot.slane %v1286_v17, 5  ;;  %v1430_v25 = vpop.f32.mrf.mxu1 }
 0x415   : > { %v4683_v28 = vpop.f32.mrf.mxu0  ;;  %v1507_v50 = vrot.slane %v1430_v25, 2 }
 0x416   : > { %v1500_v29 = vsel %vm1499_vm8, %v1498_v22, %v1497_v18  ;;  %v4701_v31 = vpop.f32.mrf.mxu1 }
 0x417   : > { %v1289_v33 = vpop.f32.mrf.mxu0  ;;  %v1503_v34 = vsel %vm1502_vm9, %v1501_v23, %v1500_v29 }
 0x418   : > { %v1433_v37 = vpop.f32.mrf.mxu1 }
 0x419   : > { %v4684_v38 = vpop.f32.mrf.mxu0 }
 0x41a   : > { %v4702_v40 = vpop.f32.mrf.mxu1 }
 0x41b   : > { %v1382_v41 = vpop.f32.mrf.mxu0 }
 0x41c   : > { %v5757_v43 = vpop.f32.mrf.mxu1  ;;  %v1504_v39 = vrot.slane %v1382_v41, 3 }
 0x41d   : > { %v1915_v44 = vsel %vm1001_vm4, %v5757_v43, -inf  ;;  %v4695_v46 = vpop.f32.mrf.mxu0 }
 0x41e   : > { %1916 = vmax.xlane.f32.xlu0 %v1915_v44  ;;  %v4713_v36 = vpop.f32.mrf.mxu1  ;;  %v1506_v49 = vsel %vm1505_vm10, %v1504_v39, %v1503_v34 }
 0x41f   : > { %v1385_v47 = vpop.f32.mrf.mxu0  ;;  %v1509_v62 = vsel %vm1508_vm11, %v1507_v50, %v1506_v49 }
 0x420   : > { %v1562_v26 = vpop.f32.mrf.mxu1 }
 0x421   : > { %v4696_v51 = vpop.f32.mrf.mxu0 }
 0x422   : > { %v4714_v52 = vpop.f32.mrf.mxu1 }
 0x446   : > { %v5761_v54 = vpop.f32.mrf.mxu1 }
 0x447   : > { %v1921_v55 = vsel %vm1001_vm4, %v5761_v54, -inf }
 0x448   : > { %1922 = vmax.xlane.f32.xlu0 %v1921_v55  ;;  %v4725_v56 = vpop.f32.mrf.mxu1 }
 0x44a   : > { %v1662_v42 = vpop.f32.mrf.mxu1 }
 0x44c   : > { %v1478_v60 = vpop.f32.mrf.mxu0  ;;  %v4726_v61 = vpop.f32.mrf.mxu1 }
 0x44d   : > { %v1510_v57 = vrot.slane %v1478_v60, 1  ;;  %v2108_v61 = vpop.permute.xlu1 %2107 }
 0x44e   : > { %v4707_v0 = vpop.f32.mrf.mxu0  ;;  %v5770_v4 = vpop.f32.mrf.mxu1 }
 0x44f   : > { %v1512_v5 = vsel %vm1511_vm12, %v1510_v57, %v1509_v62  ;;  %v1927_v31 = vsel %vm1001_vm4, %v5770_v4, -inf }
 0x450   : > { %v1481_v6 = vpop.f32.mrf.mxu0  ;;  %v4737_v7 = vpop.f32.mrf.mxu1  ;;  %1514 = vst.msk [vmem:[%s5773_s18] sm:$0xff] %vm1100_vm5, %v1512_v5 }
 0x451   : > { %v5797_v57 = vpop.permute.xlu1 %2155 }
 0x452   : > { %v4708_v9 = vpop.f32.mrf.mxu0  ;;  %v1762_v12 = vpop.f32.mrf.mxu1 }
 0x454   : > { %v1609_v14 = vpop.f32.mrf.mxu0  ;;  %v4738_v18 = vpop.f32.mrf.mxu1 }
 0x455   : > { %v1918_v15 = vsel %vm1001_vm4, %v1609_v14, -inf }
 0x456   : > { %v5778_v2 = vpop.f32.mrf.mxu1  ;;  %1919 = vmax.xlane.f32.xlu1 %v1918_v15  ;;  %v4719_v16 = vpop.f32.mrf.mxu0 }
 0x457   : > { %v1933_v37 = vsel %vm1001_vm4, %v5778_v2, -inf }
 0x458   : > { %v1612_v63 = vpop.f32.mrf.mxu0  ;;  %v4749_v13 = vpop.f32.mrf.mxu1 }
 0x45a   : > { %v4720_v21 = vpop.f32.mrf.mxu0  ;;  %v1862_v17 = vpop.f32.mrf.mxu1 }
 0x45c   : > { %v1709_v22 = vpop.f32.mrf.mxu0  ;;  %v4750_v25 = vpop.f32.mrf.mxu1 }
 0x45d   : > { %v1924_v23 = vsel %vm1001_vm4, %v1709_v22, -inf }
 0x45e   : > { %1925 = vmax.xlane.f32.xlu0 %v1924_v23  ;;  %v4731_v28 = vpop.f32.mrf.mxu0 }
 0x460   : > { %v1712_v29 = vpop.f32.mrf.mxu0 }
 0x462   : > { %1928 = vmax.xlane.f32.xlu0 %v1927_v31  ;;  %v4732_v33 = vpop.f32.mrf.mxu0 }
 0x464   : > { %v1809_v34 = vpop.f32.mrf.mxu0 }
 0x465   : > { %v1930_v38 = vsel %vm1001_vm4, %v1809_v34, -inf }
 0x466   : > { %1934 = vmax.xlane.f32.xlu0 %v1933_v37  ;;  %1931 = vmax.xlane.f32.xlu1 %v1930_v38  ;;  %v4743_v40 = vpop.f32.mrf.mxu0 }
 0x468   : > { %v1812_v41 = vpop.f32.mrf.mxu0 }
 0x46a   : > { %v4744_v44 = vpop.f32.mrf.mxu0 }
 0x46c   : > { %v5786_v46 = vpop.f32.mrf.mxu0 }
 0x46d   : > { %v1936_v51 = vsel %vm1001_vm4, %v5786_v46, -inf }
 0x46e   : > { %v4755_v36 = vpop.f32.mrf.mxu0 }
 0x470   : > { %v1912_v47 = vpop.f32.mrf.mxu0 }
 0x472   : > { %v4756_v26 = vpop.f32.mrf.mxu0 }
 0x477   : > { %2251 = vrot.lane.b32.xlu1 %v5521_v24, %s5264_s15 }
 0x47c   : > { %2203 = vrot.lane.b32.xlu0 %v5470_v1, %s5264_s15 }
 0x49b   : > { %1937 = vmax.xlane.f32.xlu1 %v1936_v51 }
 0x4a7   : > { %v1917_v52 = vpop.xlane.xlu0 %1916 }
 0x4a8   : > { %v1939_v39 = vsub.f32 %v5757_v43, %v1917_v52  ;;  %v2113_v52 = vsel %vm1104_vm3, %v2108_v61, 0 }
 0x4aa   : > { %v1947_v55 = vmul.f32 1.442695, %v1939_v39 }
 0x4ac   : > { %5101 = vpow2.f32 %v1947_v55 }
 0x4b9   : > { %v5102_v56 = vpop.eup %5101 }
 0x4ba   : > { %v1963_v42 = vsel %vm1001_vm4, %v5102_v56, 0.0 }
 0x4bb   : > { %1964 = vadd.xlane.f32.xlu0 %v1963_v42 }
 0x4d1   : > { %v1923_v49 = vpop.xlane.xlu0 %1922 }
 0x4d2   : > { %v1941_v50 = vsub.f32 %v5761_v54, %v1923_v49 }
 0x4d4   : > { %v1951_v60 = vmul.f32 1.442695, %v1941_v50 }
 0x4d6   : > { %5103 = vpow2.f32 %v1951_v60 }
 0x4df   : > { %v1920_v62 = vpop.xlane.xlu1 %1919 }
 0x4e0   : > { %v1940_v0 = vsub.f32 %v1609_v14, %v1920_v62 }
 0x4e2   : > { %v1949_v5 = vmul.f32 1.442695, %v1940_v0 }
 0x4e3   : > { %v5799_v6 = vpop.eup %5103 }
 0x4e4   : > { %5105 = vpow2.f32 %v1949_v5  ;;  %v1969_v43 = vsel %vm1001_vm4, %v5799_v6, 0.0 }
 0x4e5   : > { %1970 = vadd.xlane.f32.xlu0 %v1969_v43  ;;  %v2161_v43 = vsel %vm1104_vm3, %v5797_v57, 0 }
 0x4e7   : > { %v1926_v7 = vpop.xlane.xlu0 %1925 }
 0x4e8   : > { %v1942_v9 = vsub.f32 %v1709_v22, %v1926_v7 }
 0x4ea   : > { %v1953_v12 = vmul.f32 1.442695, %v1942_v9 }
 0x4eb   : > { %v1929_v18 = vpop.xlane.xlu0 %1928 }
 0x4ec   : > { %5107 = vpow2.f32 %v1953_v12  ;;  %v1943_v54 = vsub.f32 %v5770_v4, %v1929_v18 }
 0x4ee   : > { %v1955_v15 = vmul.f32 1.442695, %v1943_v54 }
 0x4ef   : > { %v1932_v4 = vpop.xlane.xlu1 %1931  ;;  %v1935_v25 = vpop.xlane.xlu0 %1934 }
 0x4f0   : > { %5109 = vpow2.f32 %v1955_v15  ;;  %v1944_v22 = vsub.f32 %v1809_v34, %v1932_v4  ;;  %v1945_v23 = vsub.f32 %v5778_v2, %v1935_v25 }
 0x4f1   : > { %v5804_v16 = vpop.eup %5105 }
 0x4f2   : > { %v1966_v14 = vsel %vm1001_vm4, %v5804_v16, 0.0  ;;  %v1957_v28 = vmul.f32 1.442695, %v1944_v22  ;;  %v1959_v29 = vmul.f32 1.442695, %v1945_v23 }
 0x4f3   : > { %1967 = vadd.xlane.f32.xlu1 %v1966_v14  ;;  %v2204_v34 = vpop.permute.xlu0 %2203  ;;  %v5831_v40 = vpop.permute.xlu1 %2251 }
 0x4f4   : > { %5111 = vpow2.f32 %v1957_v28  ;;  %v2209_v60 = vsel %vm1104_vm3, %v2204_v34, 0  ;;  %v2257_v57 = vsel %vm1104_vm3, %v5831_v40, 0 }
 0x4f5   : > { %5113 = vpow2.f32 %v1959_v29 }
 0x4f9   : > { %v5808_v63 = vpop.eup %5107 }
 0x4fa   : > { %v1972_v13 = vsel %vm1001_vm4, %v5808_v63, 0.0 }
 0x4fb   : > { %1973 = vadd.xlane.f32.xlu1 %v1972_v13 }
 0x4fd   : > { %v5812_v21 = vpop.eup %5109 }
 0x4fe   : > { %v1975_v17 = vsel %vm1001_vm4, %v5812_v21, 0.0 }
 0x4ff   : > { %1976 = vadd.xlane.f32.xlu0 %v1975_v17 }
 0x501   : > { %v5821_v31 = vpop.eup %5111 }
 0x502   : > { %v1978_v33 = vsel %vm1001_vm4, %v5821_v31, 0.0  ;;  %v5825_v37 = vpop.eup %5113 }
 0x503   : > { %v1981_v38 = vsel %vm1001_vm4, %v5825_v37, 0.0 }
 0x50c   : > { %2347 = vrot.lane.b32.xlu1 %v5536_v30, %s5264_s15 }
 0x515   : > { %2299 = vrot.lane.b32.xlu0 %v5480_v8, %s5264_s15  ;;  %s6296_s15 = scalar_lea.hbm %s6340_s6, %s4427_s11 }
 0x524   : > { %v1938_v41 = vpop.xlane.xlu1 %1937 }
 0x525   : > { %v1946_v44 = vsub.f32 %v5786_v46, %v1938_v41 }
 0x527   : > { %v1961_v36 = vmul.f32 1.442695, %v1946_v44 }
 0x530   : > { %1979 = vadd.xlane.f32.xlu1 %v1978_v33 }
 0x534   : > { %1982 = vadd.xlane.f32.xlu0 %v1981_v38 }
 0x541   : > { %2474 = vrot.lane.b32.xlu1 %v5466_v59, %s5265_s19 }
 0x544   : > { %v1965_v2 = vpop.xlane.xlu0 %1964 }
 0x545   : > { %5115 = vrcp.f32 %v1965_v2 }
 0x546   : > { %5117 = vpow2.f32 %v1961_v36 }
 0x54a   : > { %2424 = vrot.lane.b32.xlu0 %v5446_v48, %s5265_s19 }
 0x54e   : > { %2422 = vrot.lane.b32.xlu0 %v5464_v58, %s5265_s19 }
 0x552   : > { %v5116_v47 = vpop.eup %5115  ;;  %2472 = vrot.lane.b32.xlu0 %v5490_v11, %s5265_s19 }
 0x553   : > { %v1995_v26 = vmul.f32 %v5116_v47, %v5102_v56  ;;  %v5851_v46 = vpop.eup %5117 }
 0x554   : > { %v1984_v39 = vsel %vm1001_vm4, %v5851_v46, 0.0 }
 0x555   : > { %v2003_v51 = vpack.c.bf16 %v1995_v26, %v1995_v26 }
 0x556   : > { %2522 = vrot.lane.b32.xlu0 %v5507_v19, %s5265_s19 }
 0x557   : > { %4760 = vmatmul.mubr.msk.bf16.vlgmr.msra.gmra.mxu1 %vm1100_vm5, %v2003_v51 }
 0x558   : > { %4770 = vmatpush3.bf16.msra.mxu1 %v2113_v52  ;;  %4771 = vmatprep.mubr.msk.bf16.mxu1 %vm5260_vm1, %v5259_v3 }
 0x559   : > { %4781 = vmatprep.subr.bf16.mxu1 %v5259_v3 }
 0x55a   : > { %2572 = vrot.lane.b32.xlu0 %v5528_v27, %s5265_s19 }
 0x55e   : > { %2622 = vrot.lane.b32.xlu0 %v5487_v10, %s5265_s19 }
 0x562   : > { %2672 = vrot.lane.b32.xlu0 %v5540_v32, %s5265_s19 }
 0x565   : > { %1985 = vadd.xlane.f32.xlu1 %v1984_v39 }
 0x566   : > { %2722 = vrot.lane.b32.xlu0 %v5510_v20, %s5265_s19 }
 0x56a   : > { %2918 = vrot.lane.b32.xlu0 %v5446_v48, %s5266_s20 }
 0x56e   : > { %v1971_v55 = vpop.xlane.xlu0 %1970 }
 0x56f   : > { %5119 = vrcp.f32 %v1971_v55 }
 0x576   : > { %2524 = vrot.lane.b32.xlu1 %v5443_v45, %s5265_s19 }
 0x57a   : > { %2574 = vrot.lane.b32.xlu1 %v5453_v53, %s5265_s19 }
 0x57c   : > { %v5120_v56 = vpop.eup %5119  ;;  %v1968_v42 = vpop.xlane.xlu1 %1967 }
 0x57d   : > { %5121 = vrcp.f32 %v1968_v42  ;;  %v1997_v49 = vmul.f32 %v5120_v56, %v5799_v6 }
 0x57e   : > { %2624 = vrot.lane.b32.xlu1 %v5470_v1, %s5265_s19 }
 0x57f   : > { %v2005_v50 = vpack.c.bf16 %v1997_v49, %v1997_v49 }
 0x581   : > { %4772 = vmatmul.mubr.msk.bf16.vlgmr.msra.gmra.mxu1 %vm1100_vm5, %v2005_v50 }
 0x582   : > { %4782 = vmatpush3.bf16.msra.mxu1 %v2209_v60  ;;  %2674 = vrot.lane.b32.xlu1 %v5521_v24, %s5265_s19 }
 0x583   : > { %4783 = vmatprep.mubr.msk.bf16.mxu1 %vm5260_vm1, %v5259_v3  ;;  %4793 = vmatprep.subr.bf16.mxu1 %v5259_v3 }
 0x584   : > { %v1974_v61 = vpop.xlane.xlu1 %1973 }
 0x585   : > { %5123 = vrcp.f32 %v1974_v61 }
 0x586   : > { %2724 = vrot.lane.b32.xlu1 %v5480_v8, %s5265_s19 }
 0x588   : > { %v1977_v62 = vpop.xlane.xlu0 %1976 }
 0x589   : > { %5125 = vrcp.f32 %v1977_v62 }
 0x58a   : > { %v5122_v0 = vpop.eup %5121  ;;  %2774 = vrot.lane.b32.xlu1 %v5536_v30, %s5265_s19 }
 0x58b   : > { %v1996_v5 = vmul.f32 %v5122_v0, %v5804_v16 }
 0x58c   : > { %v2300_v15 = vpop.permute.xlu0 %2299 }
 0x58d   : > { %v2004_v6 = vpack.c.bf16 %v1996_v5, %v1996_v5  ;;  %v2305_v14 = vsel %vm1104_vm3, %v2300_v15, 0 }
 0x58e   : > { %2772 = vrot.lane.b32.xlu1 %v5550_v35, %s5265_s19  ;;  %s5197_s19 = scalar_lea.vmem %s4251_s12, 128 }
 0x58f   : > { %4766 = vmatmul.mubr.msk.bf16.vlgmr.msra.gmra.mxu0 %vm1100_vm5, %v2004_v6  ;;  %p5198_p12 = scmp.ne.s32.totalorder %s4251_s12, %s5197_s19 }
 0x590   : > { %4776 = vmatpush3.bf16.msra.mxu0 %v2161_v43  ;;  %4777 = vmatprep.mubr.msk.bf16.mxu0 %vm5260_vm1, %v5259_v3 }
 0x591   : > { %4787 = vmatprep.subr.bf16.mxu0 %v5259_v3  ;;  %p5199_p13 = pnand %p5198_p12, %p5346_p5 }
 0x592   : > { %v5124_v7 = vpop.eup %5123  ;;  %2966 = vrot.lane.b32.xlu1 %v5466_v59, %s5266_s20 }
 0x593   : > { %v1998_v9 = vmul.f32 %v5124_v7, %v5808_v63  ;;  %v2348_v63 = vpop.permute.xlu1 %2347  ;;  %p5200_p0 = pneg %p5199_p13 }
 0x594   : > { %v2353_v23 = vsel %vm1104_vm3, %v2348_v63, 0 }
 0x595   : > { %v2006_v12 = vpack.c.bf16 %v1998_v9, %v1998_v9 }
 0x596   : > { %v5126_v18 = vpop.eup %5125  ;;  %3014 = vrot.lane.b32.xlu1 %v5443_v45, %s5266_s20 }
 0x597   : > { %4778 = vmatmul.mubr.msk.bf16.vlgmr.msra.gmra.mxu0 %vm1100_vm5, %v2006_v12  ;;  %v1999_v54 = vmul.f32 %v5126_v18, %v5812_v21 }
 0x598   : > { %4788 = vmatpush3.bf16.msra.mxu0 %v2257_v57  ;;  %4789 = vmatprep.mubr.msk.bf16.mxu0 %vm5260_vm1, %v5259_v3 }
 0x599   : > { %v2007_v16 = vpack.c.bf16 %v1999_v54, %v1999_v54  ;;  %4799 = vmatprep.subr.bf16.mxu0 %v5259_v3 }
 0x59a   : > { %3062 = vrot.lane.b32.xlu1 %v5453_v53, %s5266_s20 }
 0x59b   : > { %4784 = vmatmul.mubr.msk.bf16.vlgmr.msra.gmra.mxu1 %vm1100_vm5, %v2007_v16 }
 0x59c   : > { %4794 = vmatpush3.bf16.msra.mxu1 %v2305_v14  ;;  %4795 = vmatprep.mubr.msk.bf16.mxu1 %vm5260_vm1, %v5259_v3 }
 0x59d   : > { %4805 = vmatprep.subr.bf16.mxu1 %v5259_v3 }
 0x5b9   : > { %v1980_v13 = vpop.xlane.xlu1 %1979 }
 0x5ba   : > { %5127 = vrcp.f32 %v1980_v13 }
 0x5bd   : > { %v1983_v21 = vpop.xlane.xlu0 %1982  ;;  %v2475_v34 = vpop.permute.xlu1 %2474 }
 0x5be   : > { %5129 = vrcp.f32 %v1983_v21  ;;  %v2480_v50 = vsel %vm597_vm2, %v2475_v34, 0 }
 0x5c1   : > { %v2425_v29 = vpop.permute.xlu0 %2424 }
 0x5c2   : > { %v2430_v38 = vsel %vm597_vm2, %v2425_v29, 0 }
 0x5c7   : > { %v5128_v17 = vpop.eup %5127 }
 0x5c8   : > { %v2000_v4 = vmul.f32 %v5128_v17, %v5821_v31  ;;  %v2423_v31 = vpop.permute.xlu0 %2422 }
 0x5ca   : > { %v2008_v22 = vpack.c.bf16 %v2000_v4, %v2000_v4 }
 0x5cb   : > { %v5130_v25 = vpop.eup %5129 }
 0x5cc   : > { %4790 = vmatmul.mubr.msk.bf16.vlgmr.msra.gmra.mxu0 %vm1100_vm5, %v2008_v22  ;;  %v2001_v28 = vmul.f32 %v5130_v25, %v5825_v37  ;;  %v2473_v37 = vpop.permute.xlu0 %2472 }
 0x5cd   : > { %4800 = vmatpush3.bf16.msra.mxu0 %v2353_v23  ;;  %4801 = vmatprep.mubr.msk.bf16.mxu0 %vm5260_vm1, %v5259_v3 }
 0x5ce   : > { %v2009_v33 = vpack.c.bf16 %v2001_v28, %v2001_v28  ;;  %4811 = vmatprep.subr.bf16.mxu0 %v5259_v3 }
 0x5d0   : > { %4796 = vmatmul.mubr.msk.bf16.vlgmr.msra.gmra.mxu1 %vm1100_vm5, %v2009_v33  ;;  %v2523_v2 = vpop.permute.xlu0 %2522 }
 0x5d1   : > { %4806 = vmatpush3.bf16.xpose.msra.mxu1 %v2430_v38  ;;  %4807 = vmatprep.mubr.msk.bf16.mxu1 %vm5260_vm1, %v5259_v3 }
 0x5d2   : > { %4817 = vmatprep.subr.bf16.mxu1 %v5259_v3 }
 0x5d4   : > { %v2573_v41 = vpop.permute.xlu0 %2572 }
 0x5d8   : > { %4808 = vmatmul.mubr.msk.bf16.vlgmr.msra.gmra.mxu1 %vm597_vm2, %v2423_v31  ;;  %v2623_v47 = vpop.permute.xlu0 %2622 }
 0x5d9   : > { %4819 = vmatprep.mubr.msk.bf16.mxu1 %vm5260_vm1, %v5259_v3 }
 0x5dc   : > { %v2673_v55 = vpop.permute.xlu0 %2672 }
 0x5e0   : > { %v2723_v60 = vpop.permute.xlu0 %2722 }
 0x5ee   : > { %v1986_v40 = vpop.xlane.xlu1 %1985 }
 0x5ef   : > { %5131 = vrcp.f32 %v1986_v40 }
 0x5f2   : > { %v2525_v44 = vpop.permute.xlu1 %2524 }
 0x5f3   : > { %v2530_v36 = vsel %vm597_vm2, %v2525_v44, 0 }
 0x5f4   : > { %4818 = vmatpush3.bf16.xpose.msra.mxu1 %v2530_v36 }
 0x5f5   : > { %4829 = vmatprep.subr.bf16.mxu1 %v5259_v3 }
 0x5f6   : > { %v2575_v26 = vpop.permute.xlu1 %2574 }
 0x5f7   : > { %v2580_v0 = vsel %vm597_vm2, %v2575_v26, 0 }
 0x5fa   : > { %v2625_v51 = vpop.permute.xlu1 %2624 }
 0x5fb   : > { %v2630_v52 = vsel %vm597_vm2, %v2625_v51, 0  ;;  %4820 = vmatmul.mubr.msk.bf16.vlgmr.msra.gmra.mxu1 %vm597_vm2, %v2523_v2 }
 0x5fc   : > { %v5132_v39 = vpop.eup %5131  ;;  %4830 = vmatpush3.bf16.xpose.msra.mxu1 %v2630_v52  ;;  %4831 = vmatprep.mubr.msk.bf16.mxu1 %vm5260_vm1, %v5259_v3 }
 0x5fd   : > { %v2002_v56 = vmul.f32 %v5132_v39, %v5851_v46  ;;  %4841 = vmatprep.subr.bf16.mxu1 %v5259_v3  ;;  %v2919_v46 = vpop.permute.xlu0 %2918 }
 0x5fe   : > { %v2675_v42 = vpop.permute.xlu1 %2674  ;;  %v2924_v5 = vsel %vm1104_vm3, %v2919_v46, 0 }
 0x5ff   : > { %v2010_v49 = vpack.c.bf16 %v2002_v56, %v2002_v56  ;;  %v2680_v6 = vsel %vm597_vm2, %v2675_v42, 0 }
 0x601   : > { %4802 = vmatmul.mubr.msk.bf16.vlgmr.msra.gmra.mxu0 %vm1100_vm5, %v2010_v49 }
 0x602   : > { %4812 = vmatpush3.bf16.xpose.msra.mxu0 %v2480_v50  ;;  %v2725_v61 = vpop.permute.xlu1 %2724  ;;  %4813 = vmatprep.mubr.msk.bf16.mxu0 %vm5260_vm1, %v5259_v3 }
 0x603   : > { %v2730_v62 = vsel %vm597_vm2, %v2725_v61, 0  ;;  %4832 = vmatmul.mubr.msk.bf16.vlgmr.msra.gmra.mxu1 %vm597_vm2, %v2623_v47  ;;  %4823 = vmatprep.subr.bf16.mxu0 %v5259_v3 }
 0x604   : > { %4842 = vmatpush3.bf16.xpose.msra.mxu1 %v2730_v62  ;;  %4843 = vmatprep.mubr.msk.bf16.mxu1 %vm5260_vm1, %v5259_v3 }
 0x605   : > { %4853 = vmatprep.subr.bf16.mxu1 %v5259_v3 }
 0x606   : > { %v2775_v43 = vpop.permute.xlu1 %2774 }
 0x607   : > { %v2780_v12 = vsel %vm597_vm2, %v2775_v43, 0 }
 0x609   : > { %4814 = vmatmul.mubr.msk.bf16.vlgmr.msra.gmra.mxu0 %vm597_vm2, %v2473_v37 }
 0x60a   : > { %4824 = vmatpush3.bf16.xpose.msra.mxu0 %v2580_v0  ;;  %4825 = vmatprep.mubr.msk.bf16.mxu0 %vm5260_vm1, %v5259_v3  ;;  %v2773_v9 = vpop.permute.xlu1 %2772 }
 0x60b   : > { %4844 = vmatmul.mubr.msk.bf16.vlgmr.msra.gmra.mxu1 %vm597_vm2, %v2723_v60  ;;  %4835 = vmatprep.subr.bf16.mxu0 %v5259_v3 }
 0x60c   : > { %4854 = vmatpush3.bf16.msra.mxu1 %v2924_v5  ;;  %4855 = vmatprep.mubr.msk.bf16.mxu1 %vm5260_vm1, %v5259_v3 }
 0x60d   : > { %4865 = vmatprep.subr.bf16.mxu1 %v5259_v3 }
 0x60e   : > { %v2967_v15 = vpop.permute.xlu1 %2966 }
 0x60f   : > { %v2972_v16 = vsel %vm1104_vm3, %v2967_v15, 0 }
 0x611   : > { %4826 = vmatmul.mubr.msk.bf16.vlgmr.msra.gmra.mxu0 %vm597_vm2, %v2573_v41 }
 0x612   : > { %4836 = vmatpush3.bf16.xpose.msra.mxu0 %v2680_v6  ;;  %4837 = vmatprep.mubr.msk.bf16.mxu0 %vm5260_vm1, %v5259_v3 }
 0x613   : > { %4847 = vmatprep.subr.bf16.mxu0 %v5259_v3 }
 0x617   : > { %v2053_v7 = vpop.f32.mrf.mxu1 }
 0x619   : > { %v4761_v18 = vpop.f32.mrf.mxu1  ;;  %4838 = vmatmul.mubr.msk.bf16.vlgmr.msra.gmra.mxu0 %vm597_vm2, %v2673_v55 }
 0x61a   : > { %4848 = vmatpush3.bf16.xpose.msra.mxu0 %v2780_v12  ;;  %4849 = vmatprep.mubr.msk.bf16.mxu0 %vm5260_vm1, %v5259_v3 }
 0x61b   : > { %v2056_v57 = vpop.f32.mrf.mxu1  ;;  %4859 = vmatprep.subr.bf16.mxu0 %v5259_v3 }
 0x61d   : > { %v4762_v54 = vpop.f32.mrf.mxu1 }
 0x621   : > { %4850 = vmatmul.mubr.msk.bf16.vlgmr.msra.gmra.mxu0 %vm597_vm2, %v2773_v9 }
 0x622   : > { %4860 = vmatpush3.bf16.msra.mxu0 %v2972_v16  ;;  %4861 = vmatprep.mubr.msk.bf16.mxu0 %vm5260_vm1, %v5259_v3 }
 0x623   : > { %4871 = vmatprep.subr.bf16.mxu0 %v5259_v3 }
 0x641   : > { %v2149_v14 = vpop.f32.mrf.mxu1 }
 0x642   : > { %v2405_v22 = vrot.slane %v2149_v14, 6 }
 0x643   : > { %v4773_v63 = vpop.f32.mrf.mxu1 }
 0x645   : > { %v2152_v13 = vpop.f32.mrf.mxu1 }
 0x647   : > { %v4774_v21 = vpop.f32.mrf.mxu1 }
 0x64f   : > { %v2101_v17 = vpop.f32.mrf.mxu0 }
 0x650   : > { %v2403_v4 = vrot.slane %v2101_v17, 7 }
 0x651   : > { %v4767_v25 = vpop.f32.mrf.mxu0 }
 0x652   : > { %v2404_v23 = vsel %vm1493_vm6, %v2403_v4, %v2053_v7 }
 0x653   : > { %v2104_v28 = vpop.f32.mrf.mxu0  ;;  %v2406_v29 = vsel %vm1496_vm7, %v2405_v22, %v2404_v23 }
 0x655   : > { %v4768_v33 = vpop.f32.mrf.mxu0 }
 0x657   : > { %v2197_v38 = vpop.f32.mrf.mxu0 }
 0x658   : > { %v2407_v31 = vrot.slane %v2197_v38, 5 }
 0x659   : > { %v4779_v37 = vpop.f32.mrf.mxu0 }
 0x65a   : > { %v2408_v34 = vsel %vm1499_vm8, %v2407_v31, %v2406_v29 }
 0x65b   : > { %v2200_v2 = vpop.f32.mrf.mxu0  ;;  %v2245_v40 = vpop.f32.mrf.mxu1 }
 0x65c   : > { %v2409_v41 = vrot.slane %v2245_v40, 4 }
 0x65d   : > { %v4780_v44 = vpop.f32.mrf.mxu0  ;;  %v4785_v36 = vpop.f32.mrf.mxu1 }
 0x65e   : > { %v2410_v47 = vsel %vm1502_vm9, %v2409_v41, %v2408_v34 }
 0x65f   : > { %v2248_v26 = vpop.f32.mrf.mxu1 }
 0x661   : > { %v4786_v51 = vpop.f32.mrf.mxu1 }
 0x68c   : > { %v2293_v52 = vpop.f32.mrf.mxu0 }
 0x68d   : > { %v2411_v39 = vrot.slane %v2293_v52, 3 }
 0x68e   : > { %v4791_v55 = vpop.f32.mrf.mxu0 }
 0x68f   : > { %v2412_v56 = vsel %vm1505_vm10, %v2411_v39, %v2410_v47 }
 0x690   : > { %v2296_v42 = vpop.f32.mrf.mxu0  ;;  %v2341_v49 = vpop.f32.mrf.mxu1 }
 0x691   : > { %v2413_v50 = vrot.slane %v2341_v49, 2 }
 0x692   : > { %v4792_v60 = vpop.f32.mrf.mxu0  ;;  %v4797_v61 = vpop.f32.mrf.mxu1 }
 0x693   : > { %v2414_v62 = vsel %vm1508_vm11, %v2413_v50, %v2412_v56 }
 0x694   : > { %v2344_v46 = vpop.f32.mrf.mxu1 }
 0x696   : > { %v4798_v0 = vpop.f32.mrf.mxu1 }
 0x698   : > { %v2466_v5 = vpop.f32.mrf.mxu1 }
 0x699   : > { %v2822_v6 = vsel %vm1001_vm4, %v2466_v5, -inf }
 0x69a   : > { %2823 = vmax.xlane.f32.xlu0 %v2822_v6  ;;  %v4809_v43 = vpop.f32.mrf.mxu1 }
 0x69c   : > { %v2469_v7 = vpop.f32.mrf.mxu1 }
 0x69e   : > { %v4810_v9 = vpop.f32.mrf.mxu1 }
 0x6bb   : > { %v2566_v12 = vpop.f32.mrf.mxu1 }
 0x6bc   : > { %v2828_v18 = vsel %vm1001_vm4, %v2566_v12, -inf }
 0x6bd   : > { %2829 = vmax.xlane.f32.xlu0 %v2828_v18  ;;  %v4821_v57 = vpop.f32.mrf.mxu1 }
 0x6bf   : > { %v2569_v54 = vpop.f32.mrf.mxu1 }
 0x6c1   : > { %v2389_v15 = vpop.f32.mrf.mxu0  ;;  %v4822_v16 = vpop.f32.mrf.mxu1 }
 0x6c2   : > { %v2415_v14 = vrot.slane %v2389_v15, 1  ;;  %v3015_v15 = vpop.permute.xlu1 %3014 }
 0x6c3   : > { %v4803_v63 = vpop.f32.mrf.mxu0  ;;  %v5973_v13 = vpop.f32.mrf.mxu1 }
 0x6c4   : > { %v5976_v21 = vsel %vm1511_vm12, %v2415_v14, %v2414_v62  ;;  %v2834_v26 = vsel %vm1001_vm4, %v5973_v13, -inf }
 0x6c5   : > { %v2392_v17 = vpop.f32.mrf.mxu0  ;;  %v4833_v4 = vpop.f32.mrf.mxu1 }
 0x6c6   : > { %v5999_v16 = vpop.permute.xlu1 %3062 }
 0x6c7   : > { %v4804_v22 = vpop.f32.mrf.mxu0  ;;  %v2669_v25 = vpop.f32.mrf.mxu1 }
 0x6c9   : > { %v2516_v23 = vpop.f32.mrf.mxu0  ;;  %v4834_v28 = vpop.f32.mrf.mxu1 }
 0x6ca   : > { %v2825_v29 = vsel %vm1001_vm4, %v2516_v23, -inf }
 0x6cb   : > { %v5979_v33 = vpop.f32.mrf.mxu1  ;;  %2826 = vmax.xlane.f32.xlu1 %v2825_v29  ;;  %v4815_v38 = vpop.f32.mrf.mxu0 }
 0x6cc   : > { %v2840_v39 = vsel %vm1001_vm4, %v5979_v33, -inf }
 0x6cd   : > { %v2519_v31 = vpop.f32.mrf.mxu0  ;;  %v4845_v37 = vpop.f32.mrf.mxu1 }
 0x6cf   : > { %v4816_v34 = vpop.f32.mrf.mxu0  ;;  %v2769_v2 = vpop.f32.mrf.mxu1 }
 0x6d1   : > { %v2616_v40 = vpop.f32.mrf.mxu0  ;;  %v4846_v41 = vpop.f32.mrf.mxu1 }
 0x6d2   : > { %v2831_v44 = vsel %vm1001_vm4, %v2616_v40, -inf }
 0x6d3   : > { %2832 = vmax.xlane.f32.xlu0 %v2831_v44  ;;  %v4827_v36 = vpop.f32.mrf.mxu0 }
 0x6d5   : > { %v2619_v47 = vpop.f32.mrf.mxu0 }
 0x6d7   : > { %2835 = vmax.xlane.f32.xlu0 %v2834_v26  ;;  %v4828_v51 = vpop.f32.mrf.mxu0 }
 0x6d9   : > { %v2716_v52 = vpop.f32.mrf.mxu0 }
 0x6da   : > { %v2837_v55 = vsel %vm1001_vm4, %v2716_v52, -inf }
 0x6db   : > { %2841 = vmax.xlane.f32.xlu0 %v2840_v39  ;;  %2838 = vmax.xlane.f32.xlu1 %v2837_v55  ;;  %v4839_v56 = vpop.f32.mrf.mxu0 }
 0x6dd   : > { %v2719_v42 = vpop.f32.mrf.mxu0 }
 0x6df   : > { %v4840_v49 = vpop.f32.mrf.mxu0 }
 0x6e1   : > { %v5987_v50 = vpop.f32.mrf.mxu0 }
 0x6e2   : > { %v2843_v46 = vsel %vm1001_vm4, %v5987_v50, -inf }
 0x6e3   : > { %v4851_v60 = vpop.f32.mrf.mxu0 }
 0x6e5   : > { %v2819_v61 = vpop.f32.mrf.mxu0 }
 0x6e7   : > { %v4852_v62 = vpop.f32.mrf.mxu0 }
 0x6ec   : > { %3158 = vrot.lane.b32.xlu1 %v5521_v24, %s5266_s20 }
 0x6f1   : > { %3110 = vrot.lane.b32.xlu0 %v5470_v1, %s5266_s20 }
 0x710   : > { %2844 = vmax.xlane.f32.xlu1 %v2843_v46 }
 0x723   : > { %v2824_v0 = vpop.xlane.xlu0 %2823 }
 0x724   : > { %v2846_v6 = vsub.f32 %v2466_v5, %v2824_v0 }
 0x726   : > { %v2854_v43 = vmul.f32 1.442695, %v2846_v6 }
 0x728   : > { %5133 = vpow2.f32 %v2854_v43 }
 0x735   : > { %v5995_v7 = vpop.eup %5133 }
 0x736   : > { %v2870_v9 = vsel %vm1001_vm4, %v5995_v7, 0.0 }
 0x737   : > { %2871 = vadd.xlane.f32.xlu0 %v2870_v9 }
 0x746   : > { %v2830_v18 = vpop.xlane.xlu0 %2829 }
 0x747   : > { %v2848_v57 = vsub.f32 %v2566_v12, %v2830_v18 }
 0x749   : > { %v2858_v54 = vmul.f32 1.442695, %v2848_v57 }
 0x74b   : > { %5135 = vpow2.f32 %v2858_v54  ;;  %v3068_v54 = vsel %vm1104_vm3, %v5999_v16, 0 }
 0x754   : > { %v2827_v14 = vpop.xlane.xlu1 %2826 }
 0x755   : > { %v2847_v63 = vsub.f32 %v2516_v23, %v2827_v14 }
 0x757   : > { %v2856_v17 = vmul.f32 1.442695, %v2847_v63 }
 0x758   : > { %v6001_v4 = vpop.eup %5135 }
 0x759   : > { %5137 = vpow2.f32 %v2856_v17  ;;  %v2876_v5 = vsel %vm1001_vm4, %v6001_v4, 0.0 }
 0x75a   : > { %2877 = vadd.xlane.f32.xlu0 %v2876_v5 }
 0x75c   : > { %v2833_v22 = vpop.xlane.xlu0 %2832 }
 0x75d   : > { %v2849_v25 = vsub.f32 %v2616_v40, %v2833_v22 }
 0x75f   : > { %v2860_v28 = vmul.f32 1.442695, %v2849_v25 }
 0x760   : > { %v2836_v29 = vpop.xlane.xlu0 %2835 }
 0x761   : > { %5139 = vpow2.f32 %v2860_v28  ;;  %v2850_v12 = vsub.f32 %v5973_v13, %v2836_v29 }
 0x763   : > { %v2862_v38 = vmul.f32 1.442695, %v2850_v12 }
 0x764   : > { %v2839_v13 = vpop.xlane.xlu1 %2838  ;;  %v2842_v44 = vpop.xlane.xlu0 %2841 }
 0x765   : > { %5141 = vpow2.f32 %v2862_v38  ;;  %v2851_v41 = vsub.f32 %v2716_v52, %v2839_v13  ;;  %v2852_v36 = vsub.f32 %v5979_v33, %v2842_v44 }
 0x766   : > { %v6006_v31 = vpop.eup %5137 }
 0x767   : > { %v2873_v23 = vsel %vm1001_vm4, %v6006_v31, 0.0  ;;  %v2864_v47 = vmul.f32 1.442695, %v2851_v41  ;;  %v2866_v26 = vmul.f32 1.442695, %v2852_v36 }
 0x768   : > { %2874 = vadd.xlane.f32.xlu1 %v2873_v23  ;;  %v3159_v33 = vpop.permute.xlu1 %3158  ;;  %v3111_v52 = vpop.permute.xlu0 %3110 }
 0x769   : > { %5143 = vpow2.f32 %v2864_v47  ;;  %v3116_v43 = vsel %vm1104_vm3, %v3111_v52, 0 }
 0x76a   : > { %5145 = vpow2.f32 %v2866_v26 }
 0x76e   : > { %v6010_v37 = vpop.eup %5139 }
 0x76f   : > { %v2879_v34 = vsel %vm1001_vm4, %v6010_v37, 0.0 }
 0x770   : > { %2880 = vadd.xlane.f32.xlu1 %v2879_v34 }
 0x772   : > { %v6014_v2 = vpop.eup %5141 }
 0x773   : > { %v2882_v40 = vsel %vm1001_vm4, %v6014_v2, 0.0 }
 0x774   : > { %2883 = vadd.xlane.f32.xlu0 %v2882_v40 }
 0x776   : > { %v6023_v51 = vpop.eup %5143 }
 0x777   : > { %v2885_v39 = vsel %vm1001_vm4, %v6023_v51, 0.0  ;;  %v6027_v55 = vpop.eup %5145 }
 0x778   : > { %v2888_v56 = vsel %vm1001_vm4, %v6027_v55, 0.0 }
 0x781   : > { %3254 = vrot.lane.b32.xlu1 %v5536_v30, %s5266_s20 }
 0x78a   : > { %3206 = vrot.lane.b32.xlu0 %v5480_v8, %s5266_s20  ;;  %s5272_s20 = smov [#allocation2]  }
 0x799   : > { %v2845_v42 = vpop.xlane.xlu1 %2844 }
 0x79a   : > { %v2853_v60 = vsub.f32 %v5987_v50, %v2845_v42  ;;  %v3020_v50 = vsel %vm1104_vm3, %v3015_v15, 0 }
 0x79c   : > { %v2868_v61 = vmul.f32 1.442695, %v2853_v60 }
 0x7a5   : > { %2886 = vadd.xlane.f32.xlu1 %v2885_v39 }
 0x7a9   : > { %2889 = vadd.xlane.f32.xlu0 %v2888_v56 }
 0x7b6   : > { %3381 = vrot.lane.b32.xlu1 %v5466_v59, %s5267_s26 }
 0x7bf   : > { %3331 = vrot.lane.b32.xlu0 %v5446_v48, %s5267_s26 }
 0x7c0   : > { %v2872_v49 = vpop.xlane.xlu0 %2871 }
 0x7c1   : > { %5147 = vrcp.f32 %v2872_v49 }
 0x7c2   : > { %5149 = vpow2.f32 %v2868_v61 }
 0x7c3   : > { %3329 = vrot.lane.b32.xlu0 %v5464_v58, %s5267_s26 }
 0x7c7   : > { %3379 = vrot.lane.b32.xlu0 %v5490_v11, %s5267_s26 }
 0x7cb   : > { %3429 = vrot.lane.b32.xlu0 %v5507_v19, %s5267_s26 }
 0x7ce   : > { %v5148_v62 = vpop.eup %5147 }
 0x7cf   : > { %3479 = vrot.lane.b32.xlu0 %v5528_v27, %s5267_s26  ;;  %v2902_v46 = vmul.f32 %v5148_v62, %v5995_v7  ;;  %v6052_v58 = vpop.eup %5149 }
 0x7d0   : > { %v2891_v11 = vsel %vm1001_vm4, %v6052_v58, 0.0 }
 0x7d1   : > { %v2910_v0 = vpack.c.bf16 %v2902_v46, %v2902_v46 }
 0x7d3   : > { %3529 = vrot.lane.b32.xlu0 %v5487_v10, %s5267_s26  ;;  %4856 = vmatmul.mubr.msk.bf16.vlgmr.msra.gmra.mxu1 %vm1100_vm5, %v2910_v0 }
 0x7d4   : > { %4866 = vmatpush3.bf16.msra.mxu1 %v3020_v50  ;;  %4867 = vmatprep.mubr.msk.bf16.mxu1 %vm5260_vm1, %v5259_v3 }
 0x7d5   : > { %4877 = vmatprep.subr.bf16.mxu1 %v5259_v3 }
 0x7d7   : > { %3579 = vrot.lane.b32.xlu0 %v5540_v32, %s5267_s26 }
 0x7da   : > { %2892 = vadd.xlane.f32.xlu1 %v2891_v11 }
 0x7db   : > { %3629 = vrot.lane.b32.xlu0 %v5510_v20, %s5267_s26 }
 0x7e3   : > { %v2878_v10 = vpop.xlane.xlu0 %2877 }
 0x7e4   : > { %5151 = vrcp.f32 %v2878_v10 }
 0x7eb   : > { %3431 = vrot.lane.b32.xlu1 %v5443_v45, %s5267_s26 }
 0x7ef   : > { %3481 = vrot.lane.b32.xlu1 %v5453_v53, %s5267_s26 }
 0x7f1   : > { %v5152_v19 = vpop.eup %5151  ;;  %v2875_v27 = vpop.xlane.xlu1 %2874 }
 0x7f2   : > { %5153 = vrcp.f32 %v2875_v27  ;;  %v2904_v32 = vmul.f32 %v5152_v19, %v6001_v4  ;;  %v3164_v4 = vsel %vm1104_vm3, %v3159_v33, 0 }
 0x7f3   : > { %3531 = vrot.lane.b32.xlu1 %v5470_v1, %s5267_s26 }
 0x7f4   : > { %v2912_v6 = vpack.c.bf16 %v2904_v32, %v2904_v32 }
 0x7f6   : > { %4868 = vmatmul.mubr.msk.bf16.vlgmr.msra.gmra.mxu1 %vm1100_vm5, %v2912_v6 }
 0x7f7   : > { %4878 = vmatpush3.bf16.msra.mxu1 %v3116_v43  ;;  %3581 = vrot.lane.b32.xlu1 %v5521_v24, %s5267_s26 }
 0x7f8   : > { %4879 = vmatprep.mubr.msk.bf16.mxu1 %vm5260_vm1, %v5259_v3  ;;  %4889 = vmatprep.subr.bf16.mxu1 %v5259_v3 }
 0x7f9   : > { %v2881_v20 = vpop.xlane.xlu1 %2880 }
 0x7fa   : > { %5155 = vrcp.f32 %v2881_v20 }
 0x7fb   : > { %3631 = vrot.lane.b32.xlu1 %v5480_v8, %s5267_s26 }
 0x7fd   : > { %v2884_v7 = vpop.xlane.xlu0 %2883  ;;  %v3255_v25 = vpop.permute.xlu1 %3254 }
 0x7fe   : > { %5157 = vrcp.f32 %v2884_v7 }
 0x7ff   : > { %v5154_v9 = vpop.eup %5153  ;;  %3681 = vrot.lane.b32.xlu1 %v5536_v30, %s5267_s26 }
 0x800   : > { %v2903_v18 = vmul.f32 %v5154_v9, %v6006_v31 }
 0x801   : > { %v3207_v16 = vpop.permute.xlu0 %3206 }
 0x802   : > { %v2911_v57 = vpack.c.bf16 %v2903_v18, %v2903_v18  ;;  %v3212_v22 = vsel %vm1104_vm3, %v3207_v16, 0 }
 0x803   : > { %3679 = vrot.lane.b32.xlu1 %v5550_v35, %s5267_s26  ;;  %s5201_s26 = sshll.u32 %s5272_s20, 4  ;;  %s5202_s26 = int_to_ptr.vmem [resolvable:$false] %s5201_s26 }
 0x804   : > { %4862 = vmatmul.mubr.msk.bf16.vlgmr.msra.gmra.mxu0 %vm1100_vm5, %v2911_v57  ;;  %s5203_s25 = scalar_lea.vmem %s5202_s26, 256  ;;  %p5204_p1 = scmp.lt.s32.totalorder %s4251_s12, %s5202_s26 }
 0x805   : > { %4872 = vmatpush3.bf16.msra.mxu0 %v3068_v54  ;;  %4873 = vmatprep.mubr.msk.bf16.mxu0 %vm5260_vm1, %v5259_v3  ;;  %p5205_p2 = scmp.lt.s32.totalorder %s5203_s25, %s5197_s19 }
 0x806   : > { %4883 = vmatprep.subr.bf16.mxu0 %v5259_v3 }
 0x807   : > { %v5156_v15 = vpop.eup %5155  ;;  %p5206_p3 = por %p5205_p2, %p5204_p1 }
 0x808   : > { %v2905_v14 = vmul.f32 %v5156_v15, %v6010_v37  ;;  %v3260_v37 = vsel %vm1104_vm3, %v3255_v25, 0 }
 0x809   : > { %p5207_p4 = pnand %p5206_p3, %p5200_p0 }
 0x80a   : > { %v2913_v63 = vpack.c.bf16 %v2905_v14, %v2905_v14 }
 0x80b   : > { %v5158_v17 = vpop.eup %5157 }
 0x80c   : > { %4874 = vmatmul.mubr.msk.bf16.vlgmr.msra.gmra.mxu0 %vm1100_vm5, %v2913_v63  ;;  %v2906_v35 = vmul.f32 %v5158_v17, %v6014_v2 }
 0x80d   : > { %4884 = vmatpush3.bf16.msra.mxu0 %v3164_v4  ;;  %4885 = vmatprep.mubr.msk.bf16.mxu0 %vm5260_vm1, %v5259_v3 }
 0x80e   : > { %v2914_v5 = vpack.c.bf16 %v2906_v35, %v2906_v35  ;;  %4895 = vmatprep.subr.bf16.mxu0 %v5259_v3 }
 0x810   : > { %4880 = vmatmul.mubr.msk.bf16.vlgmr.msra.gmra.mxu1 %vm1100_vm5, %v2914_v5 }
 0x811   : > { %4890 = vmatpush3.bf16.msra.mxu1 %v3212_v22  ;;  %4891 = vmatprep.mubr.msk.bf16.mxu1 %vm5260_vm1, %v5259_v3 }
 0x812   : > { %4901 = vmatprep.subr.bf16.mxu1 %v5259_v3 }
 0x82e   : > { %v2887_v28 = vpop.xlane.xlu1 %2886 }
 0x82f   : > { %5159 = vrcp.f32 %v2887_v28 }
 0x832   : > { %v2890_v29 = vpop.xlane.xlu0 %2889  ;;  %v3382_v44 = vpop.permute.xlu1 %3381 }
 0x833   : > { %5161 = vrcp.f32 %v2890_v29  ;;  %v3387_v46 = vsel %vm597_vm2, %v3382_v44, 0 }
 0x836   : > { %v3332_v2 = vpop.permute.xlu0 %3331 }
 0x837   : > { %v3337_v13 = vsel %vm597_vm2, %v3332_v2, 0 }
 0x83a   : > { %v3330_v41 = vpop.permute.xlu0 %3329 }
 0x83c   : > { %v5160_v12 = vpop.eup %5159 }
 0x83d   : > { %v2907_v38 = vmul.f32 %v5160_v12, %v6023_v51 }
 0x83e   : > { %v3380_v36 = vpop.permute.xlu0 %3379 }
 0x83f   : > { %v2915_v31 = vpack.c.bf16 %v2907_v38, %v2907_v38 }
 0x840   : > { %v5162_v23 = vpop.eup %5161 }
 0x841   : > { %4886 = vmatmul.mubr.msk.bf16.vlgmr.msra.gmra.mxu0 %vm1100_vm5, %v2915_v31  ;;  %v2908_v34 = vmul.f32 %v5162_v23, %v6027_v55 }
 0x842   : > { %4896 = vmatpush3.bf16.msra.mxu0 %v3260_v37  ;;  %4897 = vmatprep.mubr.msk.bf16.mxu0 %vm5260_vm1, %v5259_v3  ;;  %v3430_v26 = vpop.permute.xlu0 %3429 }
 0x843   : > { %v2916_v40 = vpack.c.bf16 %v2908_v34, %v2908_v34  ;;  %4907 = vmatprep.subr.bf16.mxu0 %v5259_v3 }
 0x845   : > { %4892 = vmatmul.mubr.msk.bf16.vlgmr.msra.gmra.mxu1 %vm1100_vm5, %v2916_v40 }
 0x846   : > { %4902 = vmatpush3.bf16.xpose.msra.mxu1 %v3337_v13  ;;  %4903 = vmatprep.mubr.msk.bf16.mxu1 %vm5260_vm1, %v5259_v3  ;;  %v3480_v56 = vpop.permute.xlu0 %3479 }
 0x847   : > { %4913 = vmatprep.subr.bf16.mxu1 %v5259_v3 }
 0x84a   : > { %v3530_v60 = vpop.permute.xlu0 %3529 }
 0x84d   : > { %4904 = vmatmul.mubr.msk.bf16.vlgmr.msra.gmra.mxu1 %vm597_vm2, %v3330_v41 }
 0x84e   : > { %4915 = vmatprep.mubr.msk.bf16.mxu1 %vm5260_vm1, %v5259_v3 }
 0x863   : > { %v2893_v47 = vpop.xlane.xlu1 %2892 }
 0x864   : > { %5163 = vrcp.f32 %v2893_v47 }
 0x867   : > { %v3432_v51 = vpop.permute.xlu1 %3431 }
 0x868   : > { %v3437_v39 = vsel %vm597_vm2, %v3432_v51, 0 }
 0x869   : > { %4914 = vmatpush3.bf16.xpose.msra.mxu1 %v3437_v39 }
 0x86a   : > { %4925 = vmatprep.subr.bf16.mxu1 %v5259_v3 }
 0x86b   : > { %v3482_v55 = vpop.permute.xlu1 %3481 }
 0x86c   : > { %v3487_v11 = vsel %vm597_vm2, %v3482_v55, 0 }
 0x86f   : > { %v3532_v33 = vpop.permute.xlu1 %3531 }
 0x870   : > { %v3537_v52 = vsel %vm597_vm2, %v3532_v33, 0  ;;  %4916 = vmatmul.mubr.msk.bf16.vlgmr.msra.gmra.mxu1 %vm597_vm2, %v3430_v26 }
 0x871   : > { %v5164_v42 = vpop.eup %5163  ;;  %4926 = vmatpush3.bf16.xpose.msra.mxu1 %v3537_v52  ;;  %4927 = vmatprep.mubr.msk.bf16.mxu1 %vm5260_vm1, %v5259_v3 }
 0x872   : > { %v2909_v49 = vmul.f32 %v5164_v42, %v6052_v58  ;;  %4937 = vmatprep.subr.bf16.mxu1 %v5259_v3  ;;  %v3580_v58 = vpop.permute.xlu0 %3579 }
 0x873   : > { %v3582_v61 = vpop.permute.xlu1 %3581 }
 0x874   : > { %v2917_v62 = vpack.c.bf16 %v2909_v49, %v2909_v49  ;;  %v3587_v19 = vsel %vm597_vm2, %v3582_v61, 0 }
 0x876   : > { %4898 = vmatmul.mubr.msk.bf16.vlgmr.msra.gmra.mxu0 %vm1100_vm5, %v2917_v62  ;;  %v3630_v10 = vpop.permute.xlu0 %3629 }
 0x877   : > { %4908 = vmatpush3.bf16.xpose.msra.mxu0 %v3387_v46  ;;  %v3632_v0 = vpop.permute.xlu1 %3631  ;;  %4909 = vmatprep.mubr.msk.bf16.mxu0 %vm5260_vm1, %v5259_v3 }
 0x878   : > { %v3637_v50 = vsel %vm597_vm2, %v3632_v0, 0  ;;  %4928 = vmatmul.mubr.msk.bf16.vlgmr.msra.gmra.mxu1 %vm597_vm2, %v3530_v60  ;;  %4919 = vmatprep.subr.bf16.mxu0 %v5259_v3 }
 0x879   : > { %4938 = vmatpush3.bf16.xpose.msra.mxu1 %v3637_v50  ;;  %4939 = vmatprep.mubr.msk.bf16.mxu1 %vm5260_vm1, %v5259_v3 }
 0x87a   : > { %4949 = vmatprep.subr.bf16.mxu1 %v5259_v3 }
 0x87b   : > { %v3682_v27 = vpop.permute.xlu1 %3681 }
 0x87c   : > { %v3687_v32 = vsel %vm597_vm2, %v3682_v27, 0 }
 0x87e   : > { %4910 = vmatmul.mubr.msk.bf16.vlgmr.msra.gmra.mxu0 %vm597_vm2, %v3380_v36 }
 0x87f   : > { %4920 = vmatpush3.bf16.xpose.msra.mxu0 %v3487_v11  ;;  %4921 = vmatprep.mubr.msk.bf16.mxu0 %vm5260_vm1, %v5259_v3  ;;  %v3680_v43 = vpop.permute.xlu1 %3679 }
 0x880   : > { %4940 = vmatmul.mubr.msk.bf16.vlgmr.msra.gmra.mxu1 %vm597_vm2, %v3630_v10  ;;  %4931 = vmatprep.subr.bf16.mxu0 %v5259_v3 }
 0x881   : > { %4951 = vmatprep.mubr.msk.bf16.mxu1 %vm5260_vm1, %v5259_v3 }
 0x886   : > { %4922 = vmatmul.mubr.msk.bf16.vlgmr.msra.gmra.mxu0 %vm597_vm2, %v3480_v56 }
 0x887   : > { %4932 = vmatpush3.bf16.xpose.msra.mxu0 %v3587_v19  ;;  %4933 = vmatprep.mubr.msk.bf16.mxu0 %vm5260_vm1, %v5259_v3 }
 0x888   : > { %4943 = vmatprep.subr.bf16.mxu0 %v5259_v3 }
 0x88e   : > { %4934 = vmatmul.mubr.msk.bf16.vlgmr.msra.gmra.mxu0 %vm597_vm2, %v3580_v58 }
 0x88f   : > { %4944 = vmatpush3.bf16.xpose.msra.mxu0 %v3687_v32  ;;  %4945 = vmatprep.mubr.msk.bf16.mxu0 %vm5260_vm1, %v5259_v3 }
 0x890   : > { %4955 = vmatprep.subr.bf16.mxu0 %v5259_v3 }
 0x893   : > { %v2960_v6 = vpop.f32.mrf.mxu1 }
 0x895   : > { %v4857_v20 = vpop.f32.mrf.mxu1 }
 0x896   : > { %4946 = vmatmul.mubr.msk.bf16.vlgmr.msra.gmra.mxu0 %vm597_vm2, %v3680_v43 }
 0x897   : > { %v2963_v7 = vpop.f32.mrf.mxu1  ;;  %4957 = vmatprep.mubr.msk.bf16.mxu0 %vm5260_vm1, %v5259_v3 }
 0x899   : > { %v4858_v9 = vpop.f32.mrf.mxu1 }
 0x8b6   : > { %v3056_v18 = vpop.f32.mrf.mxu1 }
 0x8b7   : > { %v3312_v17 = vrot.slane %v3056_v18, 6 }
 0x8b8   : > { %v4869_v57 = vpop.f32.mrf.mxu1 }
 0x8ba   : > { %v3059_v54 = vpop.f32.mrf.mxu1 }
 0x8bc   : > { %v4870_v15 = vpop.f32.mrf.mxu1 }
 0x8c4   : > { %v3008_v14 = vpop.f32.mrf.mxu0 }
 0x8c5   : > { %v3310_v63 = vrot.slane %v3008_v14, 7 }
 0x8c6   : > { %v4863_v4 = vpop.f32.mrf.mxu0 }
 0x8c7   : > { %v3311_v35 = vsel %vm1493_vm6, %v3310_v63, %v2960_v6 }
 0x8c8   : > { %v3011_v16 = vpop.f32.mrf.mxu0  ;;  %v3313_v5 = vsel %vm1496_vm7, %v3312_v17, %v3311_v35 }
 0x8ca   : > { %v4864_v22 = vpop.f32.mrf.mxu0 }
 0x8cc   : > { %v3104_v25 = vpop.f32.mrf.mxu0 }
 0x8cd   : > { %v3314_v28 = vrot.slane %v3104_v25, 5 }
 0x8ce   : > { %v4875_v29 = vpop.f32.mrf.mxu0 }
 0x8cf   : > { %v3315_v12 = vsel %vm1499_vm8, %v3314_v28, %v3313_v5 }
 0x8d0   : > { %v3107_v38 = vpop.f32.mrf.mxu0  ;;  %v3152_v31 = vpop.f32.mrf.mxu1 }
 0x8d1   : > { %v3316_v23 = vrot.slane %v3152_v31, 4 }
 0x8d2   : > { %v4876_v37 = vpop.f32.mrf.mxu0  ;;  %v4881_v34 = vpop.f32.mrf.mxu1 }
 0x8d3   : > { %v3317_v2 = vsel %vm1502_vm9, %v3316_v23, %v3315_v12 }
 0x8d4   : > { %v3155_v40 = vpop.f32.mrf.mxu1 }
 0x8d6   : > { %v4882_v13 = vpop.f32.mrf.mxu1 }
 0x901   : > { %v3200_v41 = vpop.f32.mrf.mxu0 }
 0x902   : > { %v3318_v44 = vrot.slane %v3200_v41, 3 }
 0x903   : > { %v4887_v36 = vpop.f32.mrf.mxu0 }
 0x904   : > { %v3319_v47 = vsel %vm1505_vm10, %v3318_v44, %v3317_v2 }
 0x905   : > { %v3203_v26 = vpop.f32.mrf.mxu0  ;;  %v3248_v51 = vpop.f32.mrf.mxu1 }
 0x906   : > { %v3320_v39 = vrot.slane %v3248_v51, 2 }
 0x907   : > { %v4888_v55 = vpop.f32.mrf.mxu0  ;;  %v4893_v56 = vpop.f32.mrf.mxu1 }
 0x908   : > { %v3321_v33 = vsel %vm1508_vm11, %v3320_v39, %v3319_v47 }
 0x909   : > { %v3251_v52 = vpop.f32.mrf.mxu1 }
 0x90b   : > { %v4894_v42 = vpop.f32.mrf.mxu1 }
 0x90d   : > { %v3373_v49 = vpop.f32.mrf.mxu1 }
 0x90e   : > { %v3729_v60 = vsel %vm1001_vm4, %v3373_v49, -inf }
 0x90f   : > { %3730 = vmax.xlane.f32.xlu0 %v3729_v60  ;;  %v4905_v61 = vpop.f32.mrf.mxu1 }
 0x911   : > { %v3376_v62 = vpop.f32.mrf.mxu1 }
 0x913   : > { %v4906_v46 = vpop.f32.mrf.mxu1 }
 0x930   : > { %v3473_v0 = vpop.f32.mrf.mxu1 }
 0x931   : > { %v3735_v50 = vsel %vm1001_vm4, %v3473_v0, -inf }
 0x932   : > { %3736 = vmax.xlane.f32.xlu0 %v3735_v50  ;;  %v4917_v58 = vpop.f32.mrf.mxu1 }
 0x934   : > { %v3476_v11 = vpop.f32.mrf.mxu1 }
 0x936   : > { %v3296_v10 = vpop.f32.mrf.mxu0  ;;  %v4918_v19 = vpop.f32.mrf.mxu1 }
 0x937   : > { %v3322_v27 = vrot.slane %v3296_v10, 1 }
 0x938   : > { %v4899_v32 = vpop.f32.mrf.mxu0  ;;  %v6161_v6 = vpop.f32.mrf.mxu1 }
 0x939   : > { %v6164_v43 = vsel %vm1511_vm12, %v3322_v27, %v3321_v33  ;;  %v3741_v12 = vsel %vm1001_vm4, %v6161_v6, -inf }
 0x93a   : > { %v3299_v20 = vpop.f32.mrf.mxu0  ;;  %v4929_v7 = vpop.f32.mrf.mxu1 }
 0x93c   : > { %v4900_v9 = vpop.f32.mrf.mxu0  ;;  %v3576_v18 = vpop.f32.mrf.mxu1 }
 0x93e   : > { %v3423_v57 = vpop.f32.mrf.mxu0  ;;  %v4930_v54 = vpop.f32.mrf.mxu1 }
 0x93f   : > { %v3732_v15 = vsel %vm1001_vm4, %v3423_v57, -inf }
 0x940   : > { %v6167_v14 = vpop.f32.mrf.mxu1  ;;  %3733 = vmax.xlane.f32.xlu1 %v3732_v15  ;;  %v4911_v63 = vpop.f32.mrf.mxu0 }
 0x941   : > { %v3747_v23 = vsel %vm1001_vm4, %v6167_v14, -inf }
 0x942   : > { %v3426_v17 = vpop.f32.mrf.mxu0  ;;  %v4941_v4 = vpop.f32.mrf.mxu1 }
 0x944   : > { %v4912_v35 = vpop.f32.mrf.mxu0  ;;  %v3676_v16 = vpop.f32.mrf.mxu1 }
 0x946   : > { %v6169_v5 = vpop.f32.mrf.mxu0  ;;  %v4942_v22 = vpop.f32.mrf.mxu1 }
 0x947   : > { %v3738_v25 = vsel %vm1001_vm4, %v6169_v5, -inf }
 0x948   : > { %3739 = vmax.xlane.f32.xlu0 %v3738_v25  ;;  %v4923_v28 = vpop.f32.mrf.mxu0 }
 0x94a   : > { %v3526_v29 = vpop.f32.mrf.mxu0 }
 0x94c   : > { %3742 = vmax.xlane.f32.xlu0 %v3741_v12  ;;  %v4924_v38 = vpop.f32.mrf.mxu0 }
 0x94e   : > { %v6175_v31 = vpop.f32.mrf.mxu0 }
 0x94f   : > { %v3744_v37 = vsel %vm1001_vm4, %v6175_v31, -inf }
 0x950   : > { %3748 = vmax.xlane.f32.xlu0 %v3747_v23  ;;  %3745 = vmax.xlane.f32.xlu1 %v3744_v37  ;;  %v4935_v34 = vpop.f32.mrf.mxu0 }
 0x952   : > { %v3626_v2 = vpop.f32.mrf.mxu0 }
 0x954   : > { %v4936_v40 = vpop.f32.mrf.mxu0 }
 0x956   : > { %v6181_v13 = vpop.f32.mrf.mxu0 }
 0x957   : > { %v3750_v47 = vsel %vm1001_vm4, %v6181_v13, -inf }
 0x958   : > { %v4947_v41 = vpop.f32.mrf.mxu0 }
 0x95a   : > { %v3726_v44 = vpop.f32.mrf.mxu0 }
 0x95c   : > { %v4948_v36 = vpop.f32.mrf.mxu0 }
 0x961   : > { %3873 = vrot.lane.b32.xlu1 %v5466_v59, %s5268_s28 }
 0x965   : > { %3921 = vrot.lane.b32.xlu1 %v5443_v45, %s5268_s28 }
 0x966   : > { %3825 = vrot.lane.b32.xlu0 %v5446_v48, %s5268_s28 }
 0x989   : > { %3751 = vmax.xlane.f32.xlu1 %v3750_v47 }
 0x998   : > { %v3731_v26 = vpop.xlane.xlu0 %3730 }
 0x999   : > { %v3753_v51 = vsub.f32 %v3373_v49, %v3731_v26 }
 0x99a   : > { %3969 = vrot.lane.b32.xlu1 %v5453_v53, %s5268_s28 }
 0x99b   : > { %v3761_v39 = vmul.f32 1.442695, %v3753_v51 }
 0x99d   : > { %5165 = vpow2.f32 %v3761_v39 }
 0x9aa   : > { %v6193_v55 = vpop.eup %5165 }
 0x9ab   : > { %v3777_v59 = vsel %vm1001_vm4, %v6193_v55, 0.0 }
 0x9ac   : > { %3778 = vadd.xlane.f32.xlu0 %v3777_v59 }
 0x9bb   : > { %v3737_v45 = vpop.xlane.xlu0 %3736 }
 0x9bc   : > { %v3755_v56 = vsub.f32 %v3473_v0, %v3737_v45 }
 0x9be   : > { %v3765_v48 = vmul.f32 1.442695, %v3755_v56 }
 0x9c0   : > { %5167 = vpow2.f32 %v3765_v48 }
 0x9c9   : > { %v3734_v33 = vpop.xlane.xlu1 %3733 }
 0x9ca   : > { %v3754_v52 = vsub.f32 %v3423_v57, %v3734_v33 }
 0x9cc   : > { %v3763_v42 = vmul.f32 1.442695, %v3754_v52 }
 0x9cd   : > { %v6197_v60 = vpop.eup %5167 }
 0x9ce   : > { %5169 = vpow2.f32 %v3763_v42  ;;  %v3783_v53 = vsel %vm1001_vm4, %v6197_v60, 0.0 }
 0x9cf   : > { %3784 = vadd.xlane.f32.xlu0 %v3783_v53 }
 0x9d1   : > { %v3740_v49 = vpop.xlane.xlu0 %3739 }
 0x9d2   : > { %v3756_v9 = vsub.f32 %v6169_v5, %v3740_v49 }
 0x9d4   : > { %v3767_v18 = vmul.f32 1.442695, %v3756_v9 }
 0x9d5   : > { %v3743_v61 = vpop.xlane.xlu0 %3742 }
 0x9d6   : > { %v3757_v27 = vsub.f32 %v6161_v6, %v3743_v61 }
 0x9d8   : > { %v3769_v32 = vmul.f32 1.442695, %v3757_v27 }
 0x9d9   : > { %v3749_v62 = vpop.xlane.xlu0 %3748  ;;  %v3746_v46 = vpop.xlane.xlu1 %3745 }
 0x9da   : > { %v3759_v20 = vsub.f32 %v6167_v14, %v3749_v62  ;;  %5171 = vpow2.f32 %v3769_v32  ;;  %v3758_v57 = vsub.f32 %v6175_v31, %v3746_v46 }
 0x9db   : > { %v6201_v50 = vpop.eup %5169 }
 0x9dc   : > { %v3780_v0 = vsel %vm1001_vm4, %v6201_v50, 0.0  ;;  %v3773_v7 = vmul.f32 1.442695, %v3759_v20 }
 0x9dd   : > { %v3826_v58 = vpop.permute.xlu0 %3825  ;;  %v3874_v11 = vpop.permute.xlu1 %3873  ;;  %3781 = vadd.xlane.f32.xlu1 %v3780_v0 }
 0x9de   : > { %v3831_v10 = vsel %vm1104_vm3, %v3826_v58, 0  ;;  %v3879_v19 = vsel %vm1104_vm3, %v3874_v11, 0  ;;  %5173 = vpow2.f32 %v3773_v7 }
 0x9df   : > { %4950 = vmatpush3.bf16.msra.mxu1 %v3831_v10  ;;  %4956 = vmatpush3.bf16.msra.mxu0 %v3879_v19  ;;  %5175 = vpow2.f32 %v3767_v18 }
 0x9e0   : > { %4961 = vmatprep.subr.bf16.mxu1 %v5259_v3  ;;  %4967 = vmatprep.subr.bf16.mxu0 %v5259_v3 }
 0x9e1   : > { %v3922_v63 = vpop.permute.xlu1 %3921 }
 0x9e5   : > { %4017 = vrot.lane.b32.xlu0 %v5470_v1, %s5268_s28  ;;  %v3771_v1 = vmul.f32 1.442695, %v3758_v57 }
 0x9e7   : > { %v6217_v54 = vpop.eup %5171  ;;  %5177 = vpow2.f32 %v3771_v1 }
 0x9e8   : > { %v3789_v6 = vsel %vm1001_vm4, %v6217_v54, 0.0 }
 0x9eb   : > { %v6221_v15 = vpop.eup %5173 }
 0x9ec   : > { %v6225_v14 = vpop.eup %5175 }
 0x9ed   : > { %v3786_v17 = vsel %vm1001_vm4, %v6225_v14, 0.0 }
 0x9ee   : > { %4065 = vrot.lane.b32.xlu1 %v5521_v24, %s5268_s28  ;;  %v3795_v24 = vsel %vm1001_vm4, %v6221_v15, 0.0 }
 0x9f4   : > { %v6229_v4 = vpop.eup %5177 }
 0x9f5   : > { %v3792_v22 = vsel %vm1001_vm4, %v6229_v4, 0.0 }
 0xa04   : > { %3790 = vadd.xlane.f32.xlu0 %v3789_v6 }
 0xa08   : > { %3796 = vadd.xlane.f32.xlu0 %v3795_v24 }
 0xa12   : > { %3787 = vadd.xlane.f32.xlu1 %v3786_v17  ;;  %v3752_v35 = vpop.xlane.xlu1 %3751 }
 0xa13   : > { %v3760_v16 = vsub.f32 %v6181_v13, %v3752_v35 }
 0xa15   : > { %v3775_v5 = vmul.f32 1.442695, %v3760_v16 }
 0xa16   : > { %3793 = vadd.xlane.f32.xlu1 %v3792_v22 }
 0xa17   : > { %5179 = vpow2.f32 %v3775_v5 }
 0xa1e   : > { %4113 = vrot.lane.b32.xlu0 %v5480_v8, %s5268_s28 }
 0xa22   : > { %2417 = vrot.lane.b32.xlu0 %v5976_v21, %s5269_s29  ;;  %v3927_v21 = vsel %vm1104_vm3, %v3922_v63, 0 }
 0xa24   : > { %v6237_v25 = vpop.eup %5179 }
 0xa25   : > { %v3798_v28 = vsel %vm1001_vm4, %v6237_v25, 0.0 }
 0xa26   : > { %3799 = vadd.xlane.f32.xlu1 %v3798_v28 }
 0xa35   : > { %v3779_v29 = vpop.xlane.xlu0 %3778 }
 0xa36   : > { %5181 = vrcp.f32 %v3779_v29 }
 0xa37   : > { %4161 = vrot.lane.b32.xlu1 %v5536_v30, %s5268_s28  ;;  %v3970_v30 = vpop.permute.xlu1 %3969 }
 0xa38   : > { %v3975_v36 = vsel %vm1104_vm3, %v3970_v30, 0 }
 0xa3b   : > { %3324 = vrot.lane.b32.xlu1 %v6164_v43, %s5270_s9 }
 0xa43   : > { %v5182_v12 = vpop.eup %5181 }
 0xa44   : > { %v3809_v8 = vmul.f32 %v5182_v12, %v6193_v55 }
 0xa46   : > { %v3817_v38 = vpack.c.bf16 %v3809_v8, %v3809_v8 }
 0xa48   : > { %4952 = vmatmul.mubr.msk.bf16.vlgmr.msra.gmra.mxu1 %vm1100_vm5, %v3817_v38 }
 0xa49   : > { %4962 = vmatpush3.bf16.msra.mxu1 %v3927_v21  ;;  %4963 = vmatprep.mubr.msk.bf16.mxu1 %vm5260_vm1, %v5259_v3 }
 0xa4a   : > { %4973 = vmatprep.subr.bf16.mxu1 %v5259_v3 }
 0xa58   : > { %v3785_v31 = vpop.xlane.xlu0 %3784 }
 0xa59   : > { %5183 = vrcp.f32 %v3785_v31 }
 0xa5c   : > { %v4018_v34 = vpop.permute.xlu0 %4017 }
 0xa5d   : > { %v4023_v40 = vsel %vm1104_vm3, %v4018_v34, 0 }
 0xa66   : > { %v5184_v23 = vpop.eup %5183  ;;  %v3782_v37 = vpop.xlane.xlu1 %3781 }
 0xa67   : > { %v3811_v43 = vmul.f32 %v5184_v23, %v6197_v60  ;;  %5185 = vrcp.f32 %v3782_v37 }
 0xa69   : > { %v3819_v2 = vpack.c.bf16 %v3811_v43, %v3811_v43 }
 0xa6a   : > { %v4066_v39 = vpop.permute.xlu1 %4065 }
 0xa6b   : > { %4964 = vmatmul.mubr.msk.bf16.vlgmr.msra.gmra.mxu1 %vm1100_vm5, %v3819_v2 }
 0xa6c   : > { %4974 = vmatpush3.bf16.msra.mxu1 %v4023_v40  ;;  %4975 = vmatprep.mubr.msk.bf16.mxu1 %vm5260_vm1, %v5259_v3 }
 0xa6d   : > { %4985 = vmatprep.subr.bf16.mxu1 %v5259_v3 }
 0xa74   : > { %v5186_v13 = vpop.eup %5185 }
 0xa75   : > { %v3810_v41 = vmul.f32 %v5186_v13, %v6201_v50  ;;  %v4071_v50 = vsel %vm1104_vm3, %v4066_v39, 0 }
 0xa77   : > { %v3818_v44 = vpack.c.bf16 %v3810_v41, %v3810_v41 }
 0xa79   : > { %4958 = vmatmul.mubr.msk.bf16.vlgmr.msra.gmra.mxu0 %vm1100_vm5, %v3818_v44 }
 0xa7a   : > { %4968 = vmatpush3.bf16.msra.mxu0 %v3975_v36  ;;  %4969 = vmatprep.mubr.msk.bf16.mxu0 %vm5260_vm1, %v5259_v3 }
 0xa7b   : > { %4979 = vmatprep.subr.bf16.mxu0 %v5259_v3 }
 0xa8d   : > { %v3791_v47 = vpop.xlane.xlu0 %3790 }
 0xa8e   : > { %5187 = vrcp.f32 %v3791_v47 }
 0xa91   : > { %v3797_v26 = vpop.xlane.xlu0 %3796 }
 0xa92   : > { %5189 = vrcp.f32 %v3797_v26 }
 0xa95   : > { %v4114_v51 = vpop.permute.xlu0 %4113 }
 0xa96   : > { %v4119_v42 = vsel %vm1104_vm3, %v4114_v51, 0 }
 0xa99   : > { %v2418_v55 = vpop.permute.xlu0 %2417 }
 0xa9a   : > { %2421 = vst.msk [vmem:[%s5773_s18] sm:$0xff] %vm2420_vm13, %v2418_v55 }
 0xa9b   : > { %v5188_v59 = vpop.eup %5187  ;;  %v3788_v45 = vpop.xlane.xlu1 %3787 }
 0xa9c   : > { %v3813_v56 = vmul.f32 %v5188_v59, %v6217_v54  ;;  %5191 = vrcp.f32 %v3788_v45 }
 0xa9e   : > { %v3821_v48 = vpack.c.bf16 %v3813_v56, %v3813_v56 }
 0xa9f   : > { %v5190_v33 = vpop.eup %5189  ;;  %v3794_v52 = vpop.xlane.xlu1 %3793 }
 0xaa0   : > { %5193 = vrcp.f32 %v3794_v52  ;;  %4976 = vmatmul.mubr.msk.bf16.vlgmr.msra.gmra.mxu1 %vm1100_vm5, %v3821_v48  ;;  %v3815_v60 = vmul.f32 %v5190_v33, %v6221_v15 }
 0xaa1   : > { %4986 = vmatpush3.bf16.msra.mxu1 %v4119_v42  ;;  %4987 = vmatprep.mubr.msk.bf16.mxu1 %vm5260_vm1, %v5259_v3 }
 0xaa2   : > { %v3823_v53 = vpack.c.bf16 %v3815_v60, %v3815_v60 }
 0xaa8   : > { %4988 = vmatmul.mubr.msk.bf16.vlgmr.msra.gmra.mxu1 %vm1100_vm5, %v3823_v53 }
 0xaa9   : > { %v5192_v49 = vpop.eup %5191 }
 0xaaa   : > { %v3812_v61 = vmul.f32 %v5192_v49, %v6225_v14 }
 0xaac   : > { %v3820_v62 = vpack.c.bf16 %v3812_v61, %v3812_v61 }
 0xaad   : > { %v5194_v46 = vpop.eup %5193 }
 0xaae   : > { %4970 = vmatmul.mubr.msk.bf16.vlgmr.msra.gmra.mxu0 %vm1100_vm5, %v3820_v62  ;;  %v3814_v58 = vmul.f32 %v5194_v46, %v6229_v4 }
 0xaaf   : > { %4980 = vmatpush3.bf16.msra.mxu0 %v4071_v50  ;;  %v3800_v0 = vpop.xlane.xlu1 %3799  ;;  %4981 = vmatprep.mubr.msk.bf16.mxu0 %vm5260_vm1, %v5259_v3 }
 0xab0   : > { %5195 = vrcp.f32 %v3800_v0  ;;  %4991 = vmatprep.subr.bf16.mxu0 %v5259_v3  ;;  %v3822_v10 = vpack.c.bf16 %v3814_v58, %v3814_v58 }
 0xab3   : > { %v4162_v11 = vpop.permute.xlu1 %4161 }
 0xab4   : > { %v4167_v19 = vsel %vm1104_vm3, %v4162_v11, 0 }
 0xab6   : > { %4982 = vmatmul.mubr.msk.bf16.vlgmr.msra.gmra.mxu0 %vm1100_vm5, %v3822_v10 }
 0xab7   : > { %4992 = vmatpush3.bf16.msra.mxu0 %v4167_v19  ;;  %v3325_v27 = vpop.permute.xlu1 %3324  ;;  %4993 = vmatprep.mubr.msk.bf16.mxu0 %vm5260_vm1, %v5259_v3 }
 0xab8   : > { %3328 = vst.msk [vmem:[%s5773_s18] sm:$0xff] %vm3327_vm14, %v3325_v27 }
 0xabd   : > { %v5196_v32 = vpop.eup %5195 }
 0xabe   : > { %v3816_v20 = vmul.f32 %v5196_v32, %v6237_v25 }
 0xac0   : > { %v3824_v7 = vpack.c.bf16 %v3816_v20, %v3816_v20 }
 0xac2   : > { %4994 = vmatmul.mubr.msk.bf16.vlgmr.msra.gmra.mxu0 %vm1100_vm5, %v3824_v7 }
 0xb08   : > { %v3867_v9 = vpop.f32.mrf.mxu1 }
 0xb0a   : > { %v4953_v18 = vpop.f32.mrf.mxu1 }
 0xb0c   : > { %v3870_v57 = vpop.f32.mrf.mxu1 }
 0xb0e   : > { %v4954_v54 = vpop.f32.mrf.mxu1 }
 0xb2b   : > { %v3963_v1 = vpop.f32.mrf.mxu1 }
 0xb2c   : > { %v4219_v17 = vrot.slane %v3963_v1, 6 }
 0xb2d   : > { %v4965_v6 = vpop.f32.mrf.mxu1 }
 0xb2f   : > { %v3966_v15 = vpop.f32.mrf.mxu1 }
 0xb31   : > { %v4966_v24 = vpop.f32.mrf.mxu1 }
 0xb39   : > { %v3915_v14 = vpop.f32.mrf.mxu0 }
 0xb3a   : > { %v4217_v63 = vrot.slane %v3915_v14, 7 }
 0xb3b   : > { %v4959_v4 = vpop.f32.mrf.mxu0 }
 0xb3c   : > { %v4218_v3 = vsel %vm1493_vm6, %v4217_v63, %v3867_v9 }
 0xb3d   : > { %v3918_v35 = vpop.f32.mrf.mxu0  ;;  %v4220_v16 = vsel %vm1496_vm7, %v4219_v17, %v4218_v3 }
 0xb3f   : > { %v4960_v5 = vpop.f32.mrf.mxu0 }
 0xb60   : > { %v4059_v22 = vpop.f32.mrf.mxu1 }
 0xb61   : > { %v4223_v36 = vrot.slane %v4059_v22, 4 }
 0xb62   : > { %v4977_v25 = vpop.f32.mrf.mxu1 }
 0xb64   : > { %v4062_v28 = vpop.f32.mrf.mxu1 }
 0xb66   : > { %v4978_v29 = vpop.f32.mrf.mxu1 }
 0xb68   : > { %v4155_v12 = vpop.f32.mrf.mxu1 }
 0xb69   : > { %v4227_v51 = vrot.slane %v4155_v12, 2 }
 0xb6a   : > { %v4989_v8 = vpop.f32.mrf.mxu1 }
 0xb6c   : > { %v4158_v38 = vpop.f32.mrf.mxu1 }
 0xb6e   : > { %v4011_v21 = vpop.f32.mrf.mxu0  ;;  %v4990_v31 = vpop.f32.mrf.mxu1 }
 0xb6f   : > { %v4221_v2 = vrot.slane %v4011_v21, 5 }
 0xb70   : > { %v4971_v30 = vpop.f32.mrf.mxu0 }
 0xb71   : > { %v4222_v41 = vsel %vm1499_vm8, %v4221_v2, %v4220_v16 }
 0xb72   : > { %v4014_v23 = vpop.f32.mrf.mxu0  ;;  %v4224_v47 = vsel %vm1502_vm9, %v4223_v36, %v4222_v41 }
 0xb74   : > { %v4972_v37 = vpop.f32.mrf.mxu0 }
 0xb76   : > { %v4107_v43 = vpop.f32.mrf.mxu0 }
 0xb77   : > { %v4225_v44 = vrot.slane %v4107_v43, 3 }
 0xb78   : > { %v4983_v34 = vpop.f32.mrf.mxu0 }
 0xb79   : > { %v4226_v26 = vsel %vm1505_vm10, %v4225_v44, %v4224_v47 }
 0xb7a   : > { %v4110_v40 = vpop.f32.mrf.mxu0  ;;  %v4228_v45 = vsel %vm1508_vm11, %v4227_v51, %v4226_v26 }
 0xb7c   : > { %v4984_v13 = vpop.f32.mrf.mxu0 }
 0xb82   : > { %v4203_v39 = vpop.f32.mrf.mxu0 }
 0xb83   : > { %v4229_v55 = vrot.slane %v4203_v39, 1 }
 0xb84   : > { %v4995_v59 = vpop.f32.mrf.mxu0 }
 0xb85   : > { %v4230_v56 = vsel %vm1511_vm12, %v4229_v55, %v4228_v45 }
 0xb86   : > { %4231 = vrot.lane.b32.xlu0 %v4230_v56, %s5271_s10  ;;  %v4206_v48 = vpop.f32.mrf.mxu0 }
 0xb88   : > { %v4996_v33 = vpop.f32.mrf.mxu0 }
 0xbf8   : > { %v4232_v52 = vpop.permute.xlu0 %4231 }
 0xbf9   : > { %4235 = vst.msk [vmem:[%s5773_s18] sm:$0xff] %vm4234_vm15, %v4232_v52 }
 0xbfa   : > { %5210 = shalt.err (!%p5207_p4)
}
 0xbfb   : > { %s5211_s18 = scalar_lea.hbm %s6296_s15, 128  ;;  %s5215_s29 = scalar_lea.hbm %s6340_s6, 256 }
 0xbfc   : > { %p5212_p7 = scmp.ne.s32.totalorder %s6296_s15, %s5211_s18  ;;  %p5216_p10 = scmp.lt.s32.totalorder %s6296_s15, %s6340_s6 }
 0xbfd   : > { %p5217_p11 = scmp.lt.s32.totalorder %s5215_s29, %s5211_s18 }
 0xbfe   : > { %p5213_p8 = pnand %p5212_p7, %p5346_p5 }
 0xbff   : > { %p5218_p12 = por %p5217_p11, %p5216_p10 }
 0xc00   : > { %p5214_p9 = pneg %p5213_p8 }
 0xc02   : > { %p5219_p13 = pnand %p5218_p12, %p5214_p9 }
 0xc04   : > { %5222 = shalt.err (!%p5219_p13)
}
 0xc05   : > { %5003 = dma.vmem_to_hbm [thread:$0]  (%p5346_p5), %s4251_s12, 128, %s6296_s15, %s4237_s17  }
 0xc06 PF: > { %p5009_p0 = scmp.ge.s32.totalorder %s5257_s24, 2  ;;  %s4262_s11 = sand.u32 1, %s5245_s21  }
 0xc07   : > { %s4263_s13 = scalar_lea.sflag [#allocation3], %s4262_s11 }
 0xc08   : > { %p5006_p1 = pnand %p5009_p0, %p5350_p6 }
 0xc0a   : > { %p5007_p2 = pneg %p5006_p1 }
 0xc0c   : > { %5240 = dma.done.wait (%p5007_p2), %s4263_s13, 128  }
 0xc0d   : > { %5242 = vsyncadd (%p5007_p2), %s4263_s13, 4294967168  ;;  %p16_p3 = scmp.ge.s32.totalorder %s5333_s27, 4   ;;  %s6343_s21 = smov %s5249_s22 }
 0xc0e   : > { %s6344_s22 = smov %s5253_s23  ;;  %s6345_s23 = smov %s5344_s30 }
 0xc0f   : > { %s6346_s24 = smov %s5333_s27  ;;  %18 = sbr.rel (!%p16_p3) target bundleno = 3 (0x3), region = 82 }
 0xc14   :  { %4268 = vsyncpa [#allocation3], 1 }
 0xc15   :  { %4270 = vsyncpa [#allocation3 + $0x1], 1 }

</bundles_post_ra>
